<compile_context>
chip_gen: v6e
topology: v6e:2x2x1
jax: 0.10.0
libtpu: 0.0.40
codegen_flags: <defaults>
</compile_context>

<pallas_src>
import functools

import jax
import jax.numpy as jnp
from jax import lax
from jax.experimental import pallas as pl
from jax.experimental.pallas import tpu as pltpu


def _round_up(x, m):
    return ((x + m - 1) // m) * m


def _pick_band_rows(H, W, C, requested=None, budget_bytes=2 << 20):
    """Largest divisor of H whose (rows, W, C) f32 band fits the budget."""
    if requested is not None:
        assert H % requested == 0, "band_rows must divide H"
        return requested
    target = max(8, budget_bytes // max(1, W * C * 4))
    th = 1
    for d in range(1, H + 1):
        if H % d == 0 and d <= target:
            th = d
    return th


def _bottleneck_kernel(x_hbm, w1_ref, b1_ref, w2_ref, b2_ref, w3_ref, b3_ref,
                       out_ref, xband_ref, copy_sem):
    # Shapes (per grid step = one row band of one image):
    #   x_hbm    : (N, H+2, W, Cin)   full H-padded input, resident in HBM
    #   w1_ref   : (Cin, Cp)          1x1 conv (BN1 scale folded in)
    #   w2_ref   : (9*Cp, Cp)         3x3 conv, im2col layout (BN2 folded in)
    #   w3_ref   : (Cp, Cout)         1x1 expansion conv (BN3 folded in)
    #   b*_ref   : (1, C)             folded BN biases (f32)
    #   out_ref  : (1, TH, W, Cout)
    #   xband_ref: (TH+2, W, Cin)     VMEM halo-band scratch
    n = pl.program_id(0)
    h = pl.program_id(1)

    TH2, W, Cin = xband_ref.shape
    TH = TH2 - 2
    Cp = w1_ref.shape[1]
    Cout = w3_ref.shape[1]
    Hpad = x_hbm.shape[1]

    # ---- DMA the (TH+2)-row halo band of the H-padded input into VMEM.
    row0 = h * TH
    cp = pltpu.make_async_copy(x_hbm.at[n, pl.ds(row0, TH2)], xband_ref, copy_sem)
    cp.start()
    cp.wait()

    xb = xband_ref[...]                                   # (TH+2, W, Cin)

    # ---- conv1 (1x1) + bn1 bias + relu, computed on the halo rows too.
    h1 = jnp.dot(xb.reshape(TH2 * W, Cin), w1_ref[...],
                 preferred_element_type=jnp.float32)
    h1 = jnp.maximum(h1 + b1_ref[...], 0.0).reshape(TH2, W, Cp)

    # Rows coming from the zero-pad rows of the padded input must be exactly
    # zero for conv2's zero-padding semantics (bias+relu would make them
    # nonzero otherwise).
    g = h * TH + lax.broadcasted_iota(jnp.int32, (TH2, 1, 1), 0)
    valid = (g > 0) & (g < Hpad - 1)
    h1 = jnp.where(valid, h1, 0.0)

    # ---- conv2 (3x3, stride 1, pad 1) as one im2col matmul (K = 9*Cp).
    zcol = jnp.zeros((TH2, 1, Cp), jnp.float32)
    h1p = jnp.concatenate([zcol, h1, zcol], axis=1)        # (TH+2, W+2, Cp)
    taps = [h1p[dh:dh + TH, dw:dw + W, :]
            for dh in range(3) for dw in range(3)]
    patches = jnp.concatenate(taps, axis=-1).reshape(TH * W, 9 * Cp)
    h2 = jnp.dot(patches.astype(w2_ref.dtype), w2_ref[...],
                 preferred_element_type=jnp.float32)
    h2 = jnp.maximum(h2 + b2_ref[...], 0.0)                # (TH*W, Cp)

    # ---- conv3 (1x1 expansion) + bn3 bias.
    h3 = jnp.dot(h2.astype(w3_ref.dtype), w3_ref[...],
                 preferred_element_type=jnp.float32) + b3_ref[...]

    # ---- residual (downsample is None -> identity) + relu.
    # Re-read the band from VMEM (no halo rows) instead of keeping x live.
    res = xband_ref[1:TH + 1, :, :].astype(jnp.float32).reshape(TH * W, Cout)
    out = jnp.maximum(h3 + res, 0.0)
    out_ref[0] = out.reshape(TH, W, Cout).astype(out_ref.dtype)


def bottleneck_pallas(x_nhwc, params, band_rows=None,
                      compute_dtype=jnp.float32):
    """x_nhwc: (N, H, W, Cin).  Returns (N, H, W, Cout) with Cout == Cin."""
    N, H, W, Cin = x_nhwc.shape
    w1, w2, w3, s1, b1, s2, b2, s3, b3 = params
    Cp = w1.shape[1]
    Cout = w3.shape[1]
    assert Cin == Cout, \
        "identity residual requires inplanes == planes * expansion"

    LANE = 128
    Cinp = _round_up(Cin, LANE)
    Cpp = _round_up(Cp, LANE)
    Coutp = _round_up(Cout, LANE)
    assert Cinp == Coutp

    # ---- fold BN scales into conv weights (bias-only BN left in kernel).
    w1f = (w1 * s1[0][None, :]).astype(compute_dtype)
    w2f = (w2 * s2[0][None, None, None, :]).astype(compute_dtype)
    w3f = (w3 * s3[0][None, :]).astype(compute_dtype)

    # ---- zero-pad channel dims to lane multiples (lane-dense matmuls/stores).
    w1p = jnp.zeros((Cinp, Cpp), compute_dtype).at[:Cin, :Cp].set(w1f)
    w2p = jnp.zeros((3, 3, Cpp, Cpp), compute_dtype).at[:, :, :Cp, :Cp].set(w2f)
    w2p = w2p.reshape(9 * Cpp, Cpp)                       # im2col weight layout
    w3p = jnp.zeros((Cpp, Coutp), compute_dtype).at[:Cp, :Cout].set(w3f)
    b1p = jnp.zeros((1, Cpp), jnp.float32).at[:, :Cp].set(b1)
    b2p = jnp.zeros((1, Cpp), jnp.float32).at[:, :Cp].set(b2)
    b3p = jnp.zeros((1, Coutp), jnp.float32).at[:, :Cout].set(b3)

    # ---- pad input: one zero row top/bottom along H (3x3 halo), channels->Cinp.
    x_p = jnp.zeros((N, H + 2, W, Cinp), compute_dtype)
    x_p = x_p.at[:, 1:H + 1, :, :Cin].set(x_nhwc.astype(compute_dtype))

    TH = _pick_band_rows(H, W, Coutp, band_rows)
    nbands = H // TH

    itm = jnp.dtype(compute_dtype).itemsize
    band_bytes = (
        (TH + 2) * W * Cinp * itm                         # x halo-band scratch
        + 2 * TH * W * Coutp * itm                        # double-buffered out
        + 2 * (w1p.size + w2p.size + w3p.size) * itm      # weights (2 bufs)
        + 2 * (b1p.size + b2p.size + b3p.size) * 4
        + 4 * ((TH + 2) * (W + 2) * Cpp                   # h1 / padded h1
               + 10 * TH * W * Cpp                        # im2col patches + h2
               + 2 * TH * W * Coutp                       # h3 / out staging
               + (TH + 2) * W * Cinp)                     # f32 view of band
    )
    vmem_limit = int(min(max(2 * band_bytes, 16 << 20), 60 << 20))

    est_flops = 2 * N * H * W * (Cinp * Cpp + 9 * Cpp * Cpp + Cpp * Coutp)
    bytes_acc = int(x_p.size * itm
                    + N * H * W * Coutp * jnp.dtype(x_nhwc.dtype).itemsize
                    + (w1p.size + w2p.size + w3p.size) * itm
                    + (b1p.size + b2p.size + b3p.size) * 4)

    full = lambda a: pl.BlockSpec(a.shape, lambda n, h: (0,) * a.ndim)

    out_padded = pl.pallas_call(
        _bottleneck_kernel,
        out_shape=jax.ShapeDtypeStruct((N, H, W, Coutp), x_nhwc.dtype),
        grid_spec=pltpu.PrefetchScalarGridSpec(
            num_scalar_prefetch=0,
            grid=(N, nbands),
            in_specs=[
                pl.BlockSpec(memory_space=pl.ANY),        # x stays in HBM
                full(w1p), full(b1p), full(w2p), full(b2p), full(w3p), full(b3p),
            ],
            out_specs=pl.BlockSpec((1, TH, W, Coutp),
                                   lambda n, h: (n, h, 0, 0)),
            scratch_shapes=[
                pltpu.VMEM((TH + 2, W, Cinp), compute_dtype),
                pltpu.SemaphoreType.DMA(()),
            ],
        ),
        compiler_params=pltpu.CompilerParams(
            dimension_semantics=("parallel", "parallel"),
            vmem_limit_bytes=vmem_limit),
        cost_estimate=pl.CostEstimate(flops=int(est_flops),
                                      transcendentals=0,
                                      bytes_accessed=bytes_acc),
    )(x_p, w1p, b1p, w2p, b2p, w3p, b3p)

    return out_padded[..., :Cout]


def _fold_bn(gamma, beta, mean, var, eps=1e-5):
    scale = gamma / jnp.sqrt(var + eps)
    bias = beta - mean * scale
    return scale.reshape(1, -1), bias.reshape(1, -1)


def make_params(key, inplanes, planes, expansion=4):
    outplanes = planes * expansion
    ks = jax.random.split(key, 12)

    def u(k, shape, scale=0.1):
        return scale * jax.random.normal(k, shape, jnp.float32)

    # conv weights in (..., Cin, Cout) layout (matmul-ready)
    w1 = u(ks[0], (inplanes, planes))
    w2 = u(ks[1], (3, 3, planes, planes))
    w3 = u(ks[2], (planes, outplanes))

    def bn(k, c):
        k1, k2, k3, k4 = jax.random.split(k, 4)
        gamma = 1.0 + 0.1 * jax.random.normal(k1, (c,), jnp.float32)
        beta = 0.1 * jax.random.normal(k2, (c,), jnp.float32)
        mean = 0.1 * jax.random.normal(k3, (c,), jnp.float32)
        var = jnp.abs(jax.random.normal(k4, (c,), jnp.float32)) + 0.5
        return _fold_bn(gamma, beta, mean, var)

    s1, b1 = bn(ks[3], planes)
    s2, b2 = bn(ks[4], planes)
    s3, b3 = bn(ks[5], outplanes)
    return (w1, w2, w3, s1, b1, s2, b2, s3, b3)


def bottleneck_reference(x_nhwc, params):
    """Plain-JAX reference for correctness checking."""
    w1, w2, w3, s1, b1, s2, b2, s3, b3 = params
    h = jnp.einsum('nhwc,cd->nhwd', x_nhwc, w1)
    h = jnp.maximum(h * s1[0] + b1[0], 0.0)
    h = lax.conv_general_dilated(
        h, w2, window_strides=(1, 1), padding=((1, 1), (1, 1)),
        dimension_numbers=('NHWC', 'HWIO', 'NHWC'))
    h = jnp.maximum(h * s2[0] + b2[0], 0.0)
    h = jnp.einsum('nhwc,cd->nhwd', h, w3)
    h = h * s3[0] + b3[0]
    return jnp.maximum(h + x_nhwc, 0.0)


if __name__ == "__main__":
    # Small shapes: inplanes must equal planes * expansion (downsample=None).
    N, inplanes, planes, H, W = 2, 16, 4, 16, 16

    key = jax.random.PRNGKey(0)
    kx, kp = jax.random.split(key)
    x_nchw = jax.random.normal(kx, (N, inplanes, H, W), jnp.float32)
    params = make_params(kp, inplanes, planes)

    x_nhwc = jnp.transpose(x_nchw, (0, 2, 3, 1))          # NCHW -> NHWC
    # band_rows=8 -> grid (N, 2): exercises the row-band tiling + halo logic.
    out_nhwc = bottleneck_pallas(x_nhwc, params, band_rows=8)
    out_nchw = jnp.transpose(out_nhwc, (0, 3, 1, 2))      # back to NCHW
    jax.block_until_ready(out_nchw)

    ref = jnp.transpose(bottleneck_reference(x_nhwc, params), (0, 3, 1, 2))
    assert out_nchw.shape == (N, planes * 4, H, W)
    err = float(jnp.max(jnp.abs(out_nchw - ref)))
    assert jnp.allclose(out_nchw, ref, atol=1e-4, rtol=1e-4), err

    print("KERNEL_OK")
</pallas_src>

<mosaic_0001>
module attributes {stable_mosaic.version = 11 : i64} {
  func.func @_bottleneck_kernel(%arg0: i32, %arg1: i32, %arg2: memref<2x18x16x128xf32, #tpu.memory_space<any>>, %arg3: memref<128x128xf32, #tpu.memory_space<vmem>>, %arg4: memref<1x128xf32, #tpu.memory_space<vmem>>, %arg5: memref<1152x128xf32, #tpu.memory_space<vmem>>, %arg6: memref<1x128xf32, #tpu.memory_space<vmem>>, %arg7: memref<128x128xf32, #tpu.memory_space<vmem>>, %arg8: memref<1x128xf32, #tpu.memory_space<vmem>>, %arg9: memref<1x8x16x128xf32, #tpu.memory_space<vmem>>, %arg10: memref<10x16x128xf32, #tpu.memory_space<vmem>>, %arg11: memref<!tpu.dma_semaphore, #tpu.memory_space<semaphore_mem>>) attributes {dimension_semantics = [#tpu.dimension_semantics<parallel>, #tpu.dimension_semantics<parallel>], iteration_bounds = array<i64: 2, 2>, scalar_prefetch = 0 : i64, scratch_operands = 2 : i64, tpu.core_type = #tpu.core_type<tc>, window_params = [{}, {pipeline_mode = #tpu.pipeline_mode<synchronous>, transform_indices = @transform_1, window_bounds = array<i64: 128, 128>}, {pipeline_mode = #tpu.pipeline_mode<synchronous>, transform_indices = @transform_2, window_bounds = array<i64: 1, 128>}, {pipeline_mode = #tpu.pipeline_mode<synchronous>, transform_indices = @transform_3, window_bounds = array<i64: 1152, 128>}, {pipeline_mode = #tpu.pipeline_mode<synchronous>, transform_indices = @transform_4, window_bounds = array<i64: 1, 128>}, {pipeline_mode = #tpu.pipeline_mode<synchronous>, transform_indices = @transform_5, window_bounds = array<i64: 128, 128>}, {pipeline_mode = #tpu.pipeline_mode<synchronous>, transform_indices = @transform_6, window_bounds = array<i64: 1, 128>}, {transform_indices = @transform_7, window_bounds = array<i64: 1, 8, 16, 128>}]} {
    %c8_i32 = arith.constant 8 : i32
    %0 = arith.muli %arg1, %c8_i32 : i32
    %c0_i32 = arith.constant 0 : i32
    %c0_i32_0 = arith.constant 0 : i32
    %1 = tpu.memref_slice %arg2[%arg0, %0, %c0_i32, %c0_i32_0] : memref<2x18x16x128xf32, #tpu.memory_space<any>> -> memref<1x10x16x128xf32, #tpu.memory_space<any>>
    %2 = tpu.memref_squeeze %1 : memref<1x10x16x128xf32, #tpu.memory_space<any>> -> memref<10x16x128xf32, #tpu.memory_space<any>>
    tpu.enqueue_dma source(%2 : memref<10x16x128xf32, #tpu.memory_space<any>>) target(%arg10 : memref<10x16x128xf32, #tpu.memory_space<vmem>>) target_semaphore(%arg11 : memref<!tpu.dma_semaphore, #tpu.memory_space<semaphore_mem>>)
    %c0_i32_1 = arith.constant 0 : i32
    %c0_i32_2 = arith.constant 0 : i32
    %3 = tpu.memref_slice %arg2[%arg0, %0, %c0_i32_1, %c0_i32_2] : memref<2x18x16x128xf32, #tpu.memory_space<any>> -> memref<1x10x16x128xf32, #tpu.memory_space<any>>
    %4 = tpu.memref_squeeze %3 : memref<1x10x16x128xf32, #tpu.memory_space<any>> -> memref<10x16x128xf32, #tpu.memory_space<any>>
    tpu.wait_dma2 semaphore(%arg11 : memref<!tpu.dma_semaphore, #tpu.memory_space<semaphore_mem>>) src(%4 : memref<10x16x128xf32, #tpu.memory_space<any>>) dst(%arg10 : memref<10x16x128xf32, #tpu.memory_space<vmem>>)
    %c0 = arith.constant 0 : index
    %c0_3 = arith.constant 0 : index
    %c0_4 = arith.constant 0 : index
    %5 = vector.load %arg10[%c0, %c0_3, %c0_4] : memref<10x16x128xf32, #tpu.memory_space<vmem>>, vector<10x16x128xf32>
    %6 = vector.shape_cast %5 : vector<10x16x128xf32> to vector<160x128xf32>
    %c0_5 = arith.constant 0 : index
    %c0_6 = arith.constant 0 : index
    %7 = vector.load %arg3[%c0_5, %c0_6] : memref<128x128xf32, #tpu.memory_space<vmem>>, vector<128x128xf32>
    %cst = arith.constant dense<0.000000e+00> : vector<160x128xf32>
    %8 = tpu.matmul %6, %7, %cst {dimension_numbers = #tpu.dot_dimension_numbers<[1], [0], [0], [1], [0, 0, 1, 1], [], []>} : vector<160x128xf32>, vector<128x128xf32>, vector<160x128xf32> -> vector<160x128xf32>
    %c0_7 = arith.constant 0 : index
    %c0_8 = arith.constant 0 : index
    %9 = vector.load %arg4[%c0_7, %c0_8] : memref<1x128xf32, #tpu.memory_space<vmem>>, vector<1x128xf32>
    %10 = vector.broadcast %9 : vector<1x128xf32> to vector<160x128xf32>
    %11 = arith.addf %8, %10 : vector<160x128xf32>
    %cst_9 = arith.constant 0.000000e+00 : f32
    %12 = vector.broadcast %cst_9 : f32 to vector<160x128xf32>
    %13 = arith.maximumf %11, %12 : vector<160x128xf32>
    %14 = vector.shape_cast %13 : vector<160x128xf32> to vector<10x16x128xf32>
    %c8_i32_10 = arith.constant 8 : i32
    %15 = arith.muli %arg1, %c8_i32_10 : i32
    %16 = tpu.iota {dimensions = array<i32: 0>} : vector<10x1x1xi32>
    %17 = vector.broadcast %15 : i32 to vector<10x1x1xi32>
    %18 = arith.addi %17, %16 : vector<10x1x1xi32>
    %c0_i32_11 = arith.constant 0 : i32
    %19 = vector.broadcast %c0_i32_11 : i32 to vector<10x1x1xi32>
    %20 = arith.cmpi sgt, %18, %19 : vector<10x1x1xi32>
    %c17_i32 = arith.constant 17 : i32
    %21 = vector.broadcast %c17_i32 : i32 to vector<10x1x1xi32>
    %22 = arith.cmpi slt, %18, %21 : vector<10x1x1xi32>
    %23 = arith.andi %20, %22 : vector<10x1x1xi1>
    %cst_12 = arith.constant 0.000000e+00 : f32
    %24 = vector.shape_cast %23 : vector<10x1x1xi1> to vector<10x1x1xi1>
    %25 = vector.broadcast %24 : vector<10x1x1xi1> to vector<10x16x128xi1>
    %26 = vector.broadcast %cst_12 : f32 to vector<10x16x128xf32>
    %27 = arith.select %25, %14, %26 : vector<10x16x128xi1>, vector<10x16x128xf32>
    %cst_13 = arith.constant 0.000000e+00 : f32
    %28 = vector.broadcast %cst_13 : f32 to vector<10x1x128xf32>
    %29 = tpu.concatenate %28, %27, %28 in 1 : vector<10x1x128xf32>, vector<10x16x128xf32>, vector<10x1x128xf32> -> vector<10x18x128xf32>
    %30 = vector.extract_strided_slice %29 {offsets = [0, 0, 0], sizes = [8, 16, 128], strides = [1, 1, 1]} : vector<10x18x128xf32> to vector<8x16x128xf32>
    %31 = vector.extract_strided_slice %29 {offsets = [0, 1, 0], sizes = [8, 16, 128], strides = [1, 1, 1]} : vector<10x18x128xf32> to vector<8x16x128xf32>
    %32 = vector.extract_strided_slice %29 {offsets = [0, 2, 0], sizes = [8, 16, 128], strides = [1, 1, 1]} : vector<10x18x128xf32> to vector<8x16x128xf32>
    %33 = vector.extract_strided_slice %29 {offsets = [1, 0, 0], sizes = [8, 16, 128], strides = [1, 1, 1]} : vector<10x18x128xf32> to vector<8x16x128xf32>
    %34 = vector.extract_strided_slice %29 {offsets = [1, 1, 0], sizes = [8, 16, 128], strides = [1, 1, 1]} : vector<10x18x128xf32> to vector<8x16x128xf32>
    %35 = vector.extract_strided_slice %29 {offsets = [1, 2, 0], sizes = [8, 16, 128], strides = [1, 1, 1]} : vector<10x18x128xf32> to vector<8x16x128xf32>
    %36 = vector.extract_strided_slice %29 {offsets = [2, 0, 0], sizes = [8, 16, 128], strides = [1, 1, 1]} : vector<10x18x128xf32> to vector<8x16x128xf32>
    %37 = vector.extract_strided_slice %29 {offsets = [2, 1, 0], sizes = [8, 16, 128], strides = [1, 1, 1]} : vector<10x18x128xf32> to vector<8x16x128xf32>
    %38 = vector.extract_strided_slice %29 {offsets = [2, 2, 0], sizes = [8, 16, 128], strides = [1, 1, 1]} : vector<10x18x128xf32> to vector<8x16x128xf32>
    %39 = tpu.concatenate %30, %31, %32, %33, %34, %35, %36, %37, %38 in 2 : vector<8x16x128xf32>, vector<8x16x128xf32>, vector<8x16x128xf32>, vector<8x16x128xf32>, vector<8x16x128xf32>, vector<8x16x128xf32>, vector<8x16x128xf32>, vector<8x16x128xf32>, vector<8x16x128xf32> -> vector<8x16x1152xf32>
    %40 = vector.shape_cast %39 : vector<8x16x1152xf32> to vector<128x1152xf32>
    %c0_14 = arith.constant 0 : index
    %c0_15 = arith.constant 0 : index
    %41 = vector.load %arg5[%c0_14, %c0_15] : memref<1152x128xf32, #tpu.memory_space<vmem>>, vector<1152x128xf32>
    %cst_16 = arith.constant dense<0.000000e+00> : vector<128x128xf32>
    %42 = tpu.matmul %40, %41, %cst_16 {dimension_numbers = #tpu.dot_dimension_numbers<[1], [0], [0], [1], [0, 0, 1, 1], [], []>} : vector<128x1152xf32>, vector<1152x128xf32>, vector<128x128xf32> -> vector<128x128xf32>
    %c0_17 = arith.constant 0 : index
    %c0_18 = arith.constant 0 : index
    %43 = vector.load %arg6[%c0_17, %c0_18] : memref<1x128xf32, #tpu.memory_space<vmem>>, vector<1x128xf32>
    %44 = vector.broadcast %43 : vector<1x128xf32> to vector<128x128xf32>
    %45 = arith.addf %42, %44 : vector<128x128xf32>
    %cst_19 = arith.constant 0.000000e+00 : f32
    %46 = vector.broadcast %cst_19 : f32 to vector<128x128xf32>
    %47 = arith.maximumf %45, %46 : vector<128x128xf32>
    %c0_20 = arith.constant 0 : index
    %c0_21 = arith.constant 0 : index
    %48 = vector.load %arg7[%c0_20, %c0_21] : memref<128x128xf32, #tpu.memory_space<vmem>>, vector<128x128xf32>
    %cst_22 = arith.constant dense<0.000000e+00> : vector<128x128xf32>
    %49 = tpu.matmul %47, %48, %cst_22 {dimension_numbers = #tpu.dot_dimension_numbers<[1], [0], [0], [1], [0, 0, 1, 1], [], []>} : vector<128x128xf32>, vector<128x128xf32>, vector<128x128xf32> -> vector<128x128xf32>
    %c0_23 = arith.constant 0 : index
    %c0_24 = arith.constant 0 : index
    %50 = vector.load %arg8[%c0_23, %c0_24] : memref<1x128xf32, #tpu.memory_space<vmem>>, vector<1x128xf32>
    %51 = vector.broadcast %50 : vector<1x128xf32> to vector<128x128xf32>
    %52 = arith.addf %49, %51 : vector<128x128xf32>
    %c1 = arith.constant 1 : index
    %c0_25 = arith.constant 0 : index
    %c0_26 = arith.constant 0 : index
    %53 = vector.load %arg10[%c1, %c0_25, %c0_26] : memref<10x16x128xf32, #tpu.memory_space<vmem>>, vector<8x16x128xf32>
    %54 = vector.shape_cast %53 : vector<8x16x128xf32> to vector<128x128xf32>
    %55 = arith.addf %52, %54 : vector<128x128xf32>
    %cst_27 = arith.constant 0.000000e+00 : f32
    %56 = vector.broadcast %cst_27 : f32 to vector<128x128xf32>
    %57 = arith.maximumf %55, %56 : vector<128x128xf32>
    %58 = vector.shape_cast %57 : vector<128x128xf32> to vector<8x16x128xf32>
    %c0_28 = arith.constant 0 : index
    %c0_29 = arith.constant 0 : index
    %c0_30 = arith.constant 0 : index
    %c0_31 = arith.constant 0 : index
    %59 = vector.load %arg9[%c0_28, %c0_29, %c0_30, %c0_31] : memref<1x8x16x128xf32, #tpu.memory_space<vmem>>, vector<1x8x16x128xf32>
    %60 = vector.shape_cast %59 : vector<1x8x16x128xf32> to vector<8x16x128xf32>
    %61 = vector.shape_cast %58 : vector<8x16x128xf32> to vector<1x8x16x128xf32>
    tpu.vector_store %arg9[%c0_28, %c0_29, %c0_30, %c0_31], %61 {strides = array<i32>} : memref<1x8x16x128xf32, #tpu.memory_space<vmem>>, vector<1x8x16x128xf32>,
    return
  }
  func.func @transform_1(%arg0: i32, %arg1: i32) -> (i32, i32) {
    %c0_i32 = arith.constant 0 : i32
    %c0_i32_0 = arith.constant 0 : i32
    %c0_i32_1 = arith.constant 0 : i32
    return %c0_i32, %c0_i32_0 : i32, i32
  }
  func.func @transform_2(%arg0: i32, %arg1: i32) -> (i32, i32) {
    %c0_i32 = arith.constant 0 : i32
    %c0_i32_0 = arith.constant 0 : i32
    %c0_i32_1 = arith.constant 0 : i32
    return %c0_i32, %c0_i32_0 : i32, i32
  }
  func.func @transform_3(%arg0: i32, %arg1: i32) -> (i32, i32) {
    %c0_i32 = arith.constant 0 : i32
    %c0_i32_0 = arith.constant 0 : i32
    %c0_i32_1 = arith.constant 0 : i32
    return %c0_i32, %c0_i32_0 : i32, i32
  }
  func.func @transform_4(%arg0: i32, %arg1: i32) -> (i32, i32) {
    %c0_i32 = arith.constant 0 : i32
    %c0_i32_0 = arith.constant 0 : i32
    %c0_i32_1 = arith.constant 0 : i32
    return %c0_i32, %c0_i32_0 : i32, i32
  }
  func.func @transform_5(%arg0: i32, %arg1: i32) -> (i32, i32) {
    %c0_i32 = arith.constant 0 : i32
    %c0_i32_0 = arith.constant 0 : i32
    %c0_i32_1 = arith.constant 0 : i32
    return %c0_i32, %c0_i32_0 : i32, i32
  }
  func.func @transform_6(%arg0: i32, %arg1: i32) -> (i32, i32) {
    %c0_i32 = arith.constant 0 : i32
    %c0_i32_0 = arith.constant 0 : i32
    %c0_i32_1 = arith.constant 0 : i32
    return %c0_i32, %c0_i32_0 : i32, i32
  }
  func.func @transform_7(%arg0: i32, %arg1: i32) -> (i32, i32, i32, i32) {
    %c0_i32 = arith.constant 0 : i32
    %c0_i32_0 = arith.constant 0 : i32
    %c0_i32_1 = arith.constant 0 : i32
    return %arg0, %arg1, %c0_i32, %c0_i32_0 : i32, i32, i32, i32
  }
}

</mosaic_0001>

<bundles_post_ra>
// kernel: tpu_custom_call.1
= control target key start
LH: loop header
LB: loop body
LE: loop exit
PB: predicated region body
PF: predicated region fallthrough
CT: control target
= control target key end

     0   :  { %s4256_s0 = inlined_call_operand.hbm [shape: f32[2,18,16,128], index: 0, kind: input, shape index: {}]   ;;  %s4257_s1 = inlined_call_operand.hbm [shape: f32[128,128], index: 1, kind: input, shape index: {}]   ;;  %s4258_s2 = inlined_call_operand.vmem [shape: f32[1,128], index: 2, kind: input, shape index: {}]   ;;  %s4259_s3 = inlined_call_operand.hbm [shape: f32[1152,128], index: 3, kind: input, shape index: {}]   ;;  %s4260_s4 = inlined_call_operand.vmem [shape: f32[1,128], index: 4, kind: input, shape index: {}]   ;;  %s4261_s5 = inlined_call_operand.hbm [shape: f32[128,128], index: 5, kind: input, shape index: {}]   ;;  %s4262_s6 = inlined_call_operand.vmem [shape: f32[1,128], index: 6, kind: input, shape index: {}]   ;;  %s4263_s7 = inlined_call_operand.hbm [shape: f32[2,16,16,128], index: 7, kind: output, shape index: {}]  }
   0x1   :  { %4269 = sst [smem:[#allocation45_spill]] %s4257_s1 }
   0x2   :  { %4270 = sst [smem:[#allocation46_spill]] %s4259_s3 }
   0x3   :  { %4271 = sst [smem:[#allocation47_spill]] %s4261_s5 }
   0x4   :  { %12 = vsyncpa [#allocation5], 0 }
   0x5   :  { %13 = vsyncpa [#allocation8], 0 }
   0x6   :  { %14 = vsyncpa [#allocation6], 0 }
   0x7   :  { %16 = vsyncpa [#allocation6 + $0x1], 0  ;;  %s3191_s24 = smov 0   ;;  %s3193_s25 = smov 0  }
   0x8   :  { %s3195_s26 = smov 0   ;;  %s3197_s27 = smov 0  }
   0x9   :  { %s3199_s28 = smov 0   ;;  %s3201_s29 = smov 0  }
   0xa   :  { %s3203_s30 = smov 0   ;;  %s3205_s8 = smov 0  }
   0xb LB: > { %4272 = sst [smem:[#allocation19_spill]] %s3132_s29  ;;  %s2130_s9 = sadd.s32 4294967295, %s3140_s8   ;;  %s3140_s8 = sphi %s3205_s8, %s22_s8   ;;  %s3136_s30 = sphi %s3203_s30, %s4351_s30   ;;  %s3132_s29 = sphi %s3201_s29, %s4350_s29   ;;  %s3128_s28 = sphi %s3199_s28, %s4349_s28   ;;  %s3124_s27 = sphi %s3197_s27, %s4348_s27   ;;  %s3120_s26 = sphi %s3195_s26, %s4354_s26   ;;  %s3116_s25 = sphi %s3193_s25, %s4353_s25   ;;  %s3112_s24 = sphi %s3191_s24, %s4352_s24  }
   0xc   : > { %4273 = sst [smem:[#allocation20_spill]] %s3136_s30  ;;  %s2131_s10 = sadd.s32 4294967294, %s3140_s8  }
   0xd   : > { %s31_s11 = sadd.s32 1, %s3132_s29  ;;  %s34_s12 = sadd.s32 1, %s3136_s30 }
   0xe   : > { %p32_p0 = scmp.ge.s32.totalorder %s31_s11, 2  ;;  %s169_s13 = sadd.s32 1, %s3120_s26 }
   0xf   : > { %p179_p1 = scmp.ne.s32.totalorder %s3120_s26, %s3116_s25  ;;  %p180_p2 = scmp.eq.s32.totalorder %s2130_s9, 3 }
  0x10   : > { %s4356_s11 = smov (%p32_p0, %s31_s11), 0  ;;  %s4358_s12 = smov (!%p32_p0, %s34_s12), %s3136_s30 }
  0x11   : > { %4274 = sst [smem:[#allocation21_spill]] %s4356_s11  ;;  %s165_s14 = ssub.s32 %s3132_s29, %s4356_s11 }
  0x12   : > { %p3243_p3 = por %p180_p2, %p179_p1  ;;  %p36_p4 = scmp.ge.s32.totalorder %s4358_s12, 2 }
  0x13   : > { %p185_p5 = scmp.ne.s32.totalorder %s3116_s25, %s3112_s24  ;;  %p186_p6 = scmp.eq.s32.totalorder %s2131_s10, 3 }
  0x14   : > { %p2132_p7 = scmp.ge.s32.totalorder %s3140_s8, 1  ;;  %s4360_s12 = smov (%p36_p4, %s4358_s12), 0 }
  0x15   : > { %4276 = sst [smem:[#allocation22_spill]] %s4360_s12  ;;  %p3252_p8 = por %p186_p6, %p185_p5 }
  0x16   : > { %p193_p9 = scmp.lt.s32.totalorder %s3140_s8, 5  ;;  %s164_s17 = ssub.s32 %s3136_s30, %s4360_s12 }
  0x17   : > { %s4277_s16 = scalar_select %p3252_p8, 1, 0 }
  0x18   : > { %s166_s18 = sor.u32 %s165_s14, %s164_s17  ;;  %p3259_p10 = pnand %p2132_p7, %p193_p9 }
  0x19   : > { %p167_p11 = scmp.eq.s32.totalorder %s166_s18, 0  ;;  %p3263_p12 = scmp.eq.s32.totalorder %s2130_s9, 0 }
  0x1a   : > { %p2845_p13 = pneg %p3259_p10  ;;  %s3142_s23 = smov [#allocation7]  }
  0x1b   : > { %s3270_s21 = scalar_select %p167_p11, %s3120_s26, %s169_s13  }
  0x1c   : > { %p3274_p0 = pnand %p3263_p12, %p2845_p13  ;;  %s221_s10 = sshll.u32 %s3142_s23, 4  ;;  %s222_s10 = int_to_ptr.vmem [resolvable:$true] %s221_s10 }
  0x1d   : > { %s2949_s9 = scalar_lea.vmem %s222_s10, 18432  ;;  %p2957_p6 = scmp.lt.s32.totalorder %s222_s10, %s222_s10 }
  0x1e   : > { %p2940_p1 = pneg %p3274_p0  ;;  %p2950_p2 = scmp.ne.s32.totalorder %s222_s10, %s2949_s9 }
  0x1f   : > { %p2958_p7 = scmp.lt.s32.totalorder %s2949_s9, %s2949_s9 }
  0x20   : > { %p2952_p4 = pnand %p2950_p2, %p2940_p1 }
  0x21   : > { %p2959_p9 = por %p2958_p7, %p2957_p6 }
  0x22   : > { %p2953_p5 = pneg %p2952_p4 }
  0x24   : > { %p2960_p11 = pnand %p2959_p9, %p2953_p5 }
  0x26   : > { %2963 = shalt.err (!%p2960_p11)
}
  0x27   : > { %s3143_s13 = smov 128   ;;  %s3144_s14 = smov 8  }
  0x28   : > { %s4281_s3 = sld [smem:[#allocation46_spill]]  ;;  %s3145_s23 = smov [#allocation4]  }
  0x29   : > { %s205_s12 = sshll.u32 %s3145_s23, 4  ;;  %s3146_s11 = smov [#allocation9]   ;;  %s206_s12 = int_to_ptr.vmem [resolvable:$true] %s205_s12 }
  0x2a   : > { %s237_s30 = sshll.u32 %s3146_s11, 4  ;;  %s2975_s9 = scalar_lea.vmem %s206_s12, 2048  ;;  %s238_s30 = int_to_ptr.vmem [resolvable:$true] %s237_s30 }
  0x2b   : > { %p2976_p13 = scmp.ne.s32.totalorder %s206_s12, %s2975_s9  ;;  %p2983_p5 = scmp.lt.s32.totalorder %s206_s12, %s206_s12 }
  0x2c   : > { %p2984_p6 = scmp.lt.s32.totalorder %s2975_s9, %s2975_s9 }
  0x2d   : > { %p2978_p2 = pnand %p2976_p13, %p2940_p1 }
  0x2e   : > { %2851 = dma.hbm_to_vmem [thread:$0]  (!%p3274_p0), %s4281_s3, 18432, %s222_s10, [#allocation8], %s3143_s13, %s3143_s13, %s3144_s14  }
  0x2f   : > { %p2979_p4 = pneg %p2978_p2  ;;  %p2985_p7 = por %p2984_p6, %p2983_p5 }
  0x31   : > { %p2986_p9 = pnand %p2985_p7, %p2979_p4 }
  0x33   : > { %2989 = shalt.err (!%p2986_p9)
}
  0x34   : > { %s4282_s1 = sld [smem:[#allocation45_spill]]  ;;  %s3001_s17 = scalar_lea.vmem %s238_s30, 2048 }
  0x35   : > { %p3002_p11 = scmp.ne.s32.totalorder %s238_s30, %s3001_s17  ;;  %p3009_p8 = scmp.lt.s32.totalorder %s238_s30, %s238_s30 }
  0x36   : > { %p3010_p5 = scmp.lt.s32.totalorder %s3001_s17, %s3001_s17 }
  0x37   : > { %p3004_p13 = pnand %p3002_p11, %p2940_p1 }
  0x38   : > { %p3011_p4 = por %p3010_p5, %p3009_p8 }
  0x39   : > { %p3005_p2 = pneg %p3004_p13 }
  0x3a   : > { %2848 = dma.hbm_to_vmem [thread:$0]  (!%p3274_p0), %s4282_s1, 2048, %s206_s12, [#allocation5], %s3143_s13, %s3143_s13, %s3144_s14  }
  0x3b   : > { %p3012_p6 = pnand %p3011_p4, %p3005_p2 }
  0x3d   : > { %3015 = shalt.err (!%p3012_p6)
}
  0x3e   : > { %s4283_s5 = sld [smem:[#allocation47_spill]] }
  0x40   : > { %256 = sbr.rel (%p3259_p10) target bundleno = 909 (0x38d), region = 44 }
  0x44   : > { %2854 = dma.hbm_to_vmem [thread:$0]  (!%p3274_p0), %s4283_s5, 2048, %s238_s30, [#allocation8], %s3143_s13, %s3143_s13, %s3144_s14  }
  0x45   : > { %3097 = dma.done.wait (%p3263_p12), [#allocation5], 2048  }
  0x46   : > { %3099 = vsyncadd (%p3263_p12), [#allocation5], 4294965248 }
  0x47   : > { %3101 = dma.done.wait (%p3263_p12), [#allocation8], 20480  }
  0x48   : > { %3103 = vsyncadd (%p3263_p12), [#allocation8], 4294946816  ;;  %s286_s30 = sand.u32 1, %s3116_s25   ;;  %s2203_s22 = sshll.u32 %s3124_s27, 7 }
  0x49   : > { %s2140_s19 = sshll.u32 %s286_s30, 7  ;;  %s292_s13 = smul.u32 288, %s3128_s28 }
  0x4a   : > { %s3147_s9 = smov [#allocation2]   ;;  %s3018_s5 = scalar_lea.hbm %s4256_s0, 9216 }
  0x4b   : > { %s293_s14 = sadd.s32 %s2203_s22, %s292_s13  ;;  %s303_s10 = sshll.u32 %s3147_s9, 4  ;;  %s304_s10 = int_to_ptr.vmem [resolvable:$true] %s303_s10 }
  0x4c   : > { %s2143_s11 = sshll.u32 %s293_s14, 4 }
  0x4d   : > { %s295_s20 = scalar_lea.hbm %s4256_s0, %s2143_s11 }
  0x4e   : > { %s3016_s23 = scalar_lea.hbm %s295_s20, 2560  ;;  %p3019_p10 = scmp.lt.s32.totalorder %s295_s20, %s4256_s0 }
  0x4f   : > { %p3017_p8 = scmp.ne.s32.totalorder %s295_s20, %s3016_s23  ;;  %p3020_p12 = scmp.lt.s32.totalorder %s3018_s5, %s3016_s23 }
  0x51   : > { %p3021_p0 = por %p3020_p12, %p3019_p10 }
  0x53   : > { %p3022_p1 = pnand %p3021_p0, %p3017_p8 }
  0x55   : > { %3025 = shalt.err (!%p3022_p1)  }
  0x56   : > { %s3026_s22 = scalar_lea.vmem %s304_s10, 2560  ;;  %p3031_p9 = scmp.lt.s32.totalorder %s304_s10, %s304_s10 }
  0x57   : > { %p3027_p7 = scmp.ne.s32.totalorder %s304_s10, %s3026_s22  ;;  %p3032_p11 = scmp.lt.s32.totalorder %s3026_s22, %s3026_s22 }
  0x59   : > { %p3033_p13 = por %p3032_p11, %p3031_p9 }
  0x5b   : > { %p3034_p2 = pnand %p3033_p13, %p3027_p7 }
  0x5d   : > { %3037 = shalt.err (!%p3034_p2)  }
  0x5e   : > { %306 = dma.hbm_to_vmem [thread:$0]  %s295_s20, 2560, %s304_s10, [#allocation3] }
  0x5f   : > { %s3338_s13 = scalar_lea.vmem [#allocation10], %s2140_s19 }
  0x60   : > { %3104 = dma.done.wait [#allocation3], 2560 }
  0x61   : > { %3105 = vsyncadd [#allocation3], 4294964736  ;;  %v346_v0 = vld [vmem:[#allocation4 + $0x78] sm:$0xff]  ;;  %v345_v1 = vld [vmem:[#allocation4 + $0x70] sm:$0xff]  ;;  %s4284_s1 = sshll.u32 %s3124_s27, 3  ;;  %vm639_vm5 = vcmask 1040384  }
  0x62   : > { %2625 = vmatprep.subr.mxu0 %v346_v0  ;;  %v344_v2 = vld [vmem:[#allocation4 + $0x68] sm:$0xff]  ;;  %v343_v3 = vld [vmem:[#allocation4 + $0x60] sm:$0xff]  ;;  %v342_v5 = vld [vmem:[#allocation4 + $0x58] sm:$0xff]  ;;  %vm736_vm6 = vcmask 1046528   ;;  %vm793_vm10 = vcmask 1045504   ;;  %s2204_s9 = sshll.u32 %s3124_s27, 4 }
  0x63   : > { %2626 = vmatpush3.msra.mxu0 %v346_v0  ;;  %v311_v4 = vld [vmem:[#allocation2] sm:$0xff]  ;;  %v341_v6 = vld [vmem:[#allocation4 + $0x50] sm:$0xff]  ;;  %v340_v7 = vld [vmem:[#allocation4 + $0x48] sm:$0xff]  ;;  %s2198_s10 = sshll.u32 %s3128_s28, 5  ;;  %s2024_s28 = sshll.u32 %s3338_s13, 4  ;;  %s4199_s28 = int_to_ptr.vmem [resolvable:$true] %s2024_s28 }
  0x64   : > { %2627 = vmatprep.subr.mxu0 %v345_v1  ;;  %2657 = vmatprep.mubr.f32.mxu0 %v311_v4  ;;  %v339_v8 = vld [vmem:[#allocation4 + $0x40] sm:$0xff]  ;;  %v913_v9 = vld [vmem:[#allocation7 + $0xf8] sm:$0xff]  ;;  %v912_v11 = vld [vmem:[#allocation7 + $0xf0] sm:$0xff]  ;;  %s2021_s11 = sadd.s32 %s2204_s9, %s2198_s10  ;;  %s4205_s23 = scalar_lea.sflag [#allocation6], %s286_s30 }
  0x65   : > { %2628 = vmatpush3.msra.mxu0 %v345_v1  ;;  %v897_v10 = vld [vmem:[#allocation7 + $0x78] sm:$0xff]  ;;  %2241 = vmatprep.subr.mxu1 %v913_v9  ;;  %v896_v12 = vld [vmem:[#allocation7 + $0x70] sm:$0xff]  ;;  %v911_v14 = vld [vmem:[#allocation7 + $0xe8] sm:$0xff]  ;;  %s2199_s27 = sshll.u32 %s2021_s11, 7  ;;  %s3038_s22 = scalar_lea.vmem %s4199_s28, 2048 }
  0x66   : > { %2629 = vmatprep.subr.mxu0 %v344_v2  ;;  %v338_v13 = vld [vmem:[#allocation4 + $0x38] sm:$0xff]  ;;  %2242 = vmatpush3.msra.mxu1 %v897_v10  ;;  %v895_v15 = vld [vmem:[#allocation7 + $0x68] sm:$0xff]  ;;  %v337_v16 = vld [vmem:[#allocation4 + $0x30] sm:$0xff]  ;;  %s4197_s20 = scalar_lea.hbm %s4263_s7, %s2199_s27  ;;  %p3039_p5 = scmp.ne.s32.totalorder %s4199_s28, %s3038_s22 }
  0x67   : > { %2630 = vmatpush3.msra.mxu0 %v344_v2  ;;  %2243 = vmatprep.subr.mxu1 %v912_v11  ;;  %v910_v17 = vld [vmem:[#allocation7 + $0xe0] sm:$0xff]  ;;  %v336_v19 = vld [vmem:[#allocation4 + $0x28] sm:$0xff]  ;;  %v909_v20 = vld [vmem:[#allocation7 + $0xd8] sm:$0xff] }
  0x68   : > { %2631 = vmatprep.subr.mxu0 %v343_v3  ;;  %2244 = vmatpush3.msra.mxu1 %v896_v12  ;;  %v894_v18 = vld [vmem:[#allocation7 + $0x60] sm:$0xff]  ;;  %v893_v21 = vld [vmem:[#allocation7 + $0x58] sm:$0xff]  ;;  %v908_v23 = vld [vmem:[#allocation7 + $0xd0] sm:$0xff]  ;;  %p3040_p4 = pnand %p3039_p5, %p3243_p3 }
  0x69   : > { %2632 = vmatpush3.msra.mxu0 %v343_v3  ;;  %2245 = vmatprep.subr.mxu1 %v911_v14  ;;  %v335_v22 = vld [vmem:[#allocation4 + $0x20] sm:$0xff]  ;;  %v892_v24 = vld [vmem:[#allocation7 + $0x50] sm:$0xff]  ;;  %v334_v25 = vld [vmem:[#allocation4 + $0x18] sm:$0xff] }
  0x6a   : > { %2633 = vmatprep.subr.mxu0 %v342_v5  ;;  %2246 = vmatpush3.msra.mxu1 %v895_v15  ;;  %v907_v26 = vld [vmem:[#allocation7 + $0xc8] sm:$0xff]  ;;  %v333_v28 = vld [vmem:[#allocation4 + $0x10] sm:$0xff]  ;;  %v906_v29 = vld [vmem:[#allocation7 + $0xc0] sm:$0xff]  ;;  %p3041_p6 = pneg %p3040_p4 }
  0x6b   : > { %2634 = vmatpush3.msra.mxu0 %v342_v5  ;;  %2247 = vmatprep.subr.mxu1 %v910_v17  ;;  %v891_v27 = vld [vmem:[#allocation7 + $0x48] sm:$0xff]  ;;  %v890_v30 = vld [vmem:[#allocation7 + $0x40] sm:$0xff]  ;;  %v905_v32 = vld [vmem:[#allocation7 + $0xb8] sm:$0xff] }
  0x6c   : > { %2635 = vmatprep.subr.mxu0 %v341_v6  ;;  %2248 = vmatpush3.msra.mxu1 %v894_v18  ;;  %v332_v31 = vld [vmem:[#allocation4 + $0x8] sm:$0xff]  ;;  %v889_v33 = vld [vmem:[#allocation7 + $0x38] sm:$0xff]  ;;  %v331_v34 = vld [vmem:[#allocation4] sm:$0xff] }
  0x6d   : > { %2636 = vmatpush3.msra.mxu0 %v341_v6  ;;  %2249 = vmatprep.subr.mxu1 %v909_v20  ;;  %v312_v35 = vld [vmem:[#allocation2 + $0x8] sm:$0xff]  ;;  %v945_v36 = vld [vmem:[#allocation7 + $0x1f8] sm:$0xff]  ;;  %v313_v37 = vld [vmem:[#allocation2 + $0x10] sm:$0xff] }
  0x6e   : > { %2637 = vmatprep.subr.mxu0 %v340_v7  ;;  %2250 = vmatpush3.msra.mxu1 %v893_v21  ;;  %v929_v38 = vld [vmem:[#allocation7 + $0x178] sm:$0xff]  ;;  %v944_v39 = vld [vmem:[#allocation7 + $0x1f0] sm:$0xff]  ;;  %v943_v42 = vld [vmem:[#allocation7 + $0x1e8] sm:$0xff] }
  0x6f   : > { %2638 = vmatpush3.msra.mxu0 %v340_v7  ;;  %2251 = vmatprep.subr.mxu1 %v908_v23  ;;  %v928_v40 = vld [vmem:[#allocation7 + $0x170] sm:$0xff]  ;;  %v314_v41 = vld [vmem:[#allocation2 + $0x18] sm:$0xff]  ;;  %v315_v43 = vld [vmem:[#allocation2 + $0x20] sm:$0xff] }
  0x70   : > { %2639 = vmatprep.subr.mxu0 %v339_v8  ;;  %2252 = vmatpush3.msra.mxu1 %v892_v24  ;;  %v927_v44 = vld [vmem:[#allocation7 + $0x168] sm:$0xff]  ;;  %v942_v45 = vld [vmem:[#allocation7 + $0x1e0] sm:$0xff]  ;;  %v941_v48 = vld [vmem:[#allocation7 + $0x1d8] sm:$0xff] }
  0x71   : > { %2640 = vmatpush3.msra.mxu0 %v339_v8  ;;  %2253 = vmatprep.subr.mxu1 %v907_v26  ;;  %v926_v46 = vld [vmem:[#allocation7 + $0x160] sm:$0xff]  ;;  %v316_v47 = vld [vmem:[#allocation2 + $0x28] sm:$0xff]  ;;  %v317_v49 = vld [vmem:[#allocation2 + $0x30] sm:$0xff] }
  0x72   : > { %2641 = vmatprep.subr.mxu0 %v338_v13  ;;  %2254 = vmatpush3.msra.mxu1 %v891_v27  ;;  %v925_v50 = vld [vmem:[#allocation7 + $0x158] sm:$0xff]  ;;  %v940_v51 = vld [vmem:[#allocation7 + $0x1d0] sm:$0xff]  ;;  %v939_v54 = vld [vmem:[#allocation7 + $0x1c8] sm:$0xff] }
  0x73   : > { %2642 = vmatpush3.msra.mxu0 %v338_v13  ;;  %2255 = vmatprep.subr.mxu1 %v906_v29  ;;  %v924_v52 = vld [vmem:[#allocation7 + $0x150] sm:$0xff]  ;;  %v318_v53 = vld [vmem:[#allocation2 + $0x38] sm:$0xff]  ;;  %v319_v55 = vld [vmem:[#allocation2 + $0x40] sm:$0xff] }
  0x74   : > { %2643 = vmatprep.subr.mxu0 %v337_v16  ;;  %2256 = vmatpush3.msra.mxu1 %v890_v30  ;;  %v923_v56 = vld [vmem:[#allocation7 + $0x148] sm:$0xff]  ;;  %v938_v57 = vld [vmem:[#allocation7 + $0x1c0] sm:$0xff]  ;;  %v937_v60 = vld [vmem:[#allocation7 + $0x1b8] sm:$0xff] }
  0x75   : > { %2644 = vmatpush3.msra.mxu0 %v337_v16  ;;  %2257 = vmatprep.subr.mxu1 %v905_v32  ;;  %v922_v58 = vld [vmem:[#allocation7 + $0x140] sm:$0xff]  ;;  %v320_v59 = vld [vmem:[#allocation2 + $0x48] sm:$0xff]  ;;  %v321_v61 = vld [vmem:[#allocation2 + $0x50] sm:$0xff] }
  0x76   : > { %2645 = vmatprep.subr.mxu0 %v336_v19  ;;  %2258 = vmatpush3.msra.mxu1 %v889_v33  ;;  %v322_v62 = vld [vmem:[#allocation2 + $0x58] sm:$0xff]  ;;  %v323_v63 = vld [vmem:[#allocation2 + $0x60] sm:$0xff]  ;;  %v324_v0 = vld [vmem:[#allocation2 + $0x68] sm:$0xff] }
  0x77   : > { %2646 = vmatpush3.msra.mxu0 %v336_v19  ;;  %v325_v1 = vld [vmem:[#allocation2 + $0x70] sm:$0xff]  ;;  %v326_v2 = vld [vmem:[#allocation2 + $0x78] sm:$0xff]  ;;  %v327_v3 = vld [vmem:[#allocation2 + $0x80] sm:$0xff] }
  0x78   : > { %2647 = vmatprep.subr.mxu0 %v335_v22  ;;  %v328_v4 = vld [vmem:[#allocation2 + $0x88] sm:$0xff]  ;;  %v329_v5 = vld [vmem:[#allocation2 + $0x90] sm:$0xff]  ;;  %v330_v6 = vld [vmem:[#allocation2 + $0x98] sm:$0xff] }
  0x79   : > { %2648 = vmatpush3.msra.mxu0 %v335_v22  ;;  %v921_v7 = vld [vmem:[#allocation7 + $0x138] sm:$0xff]  ;;  %v904_v8 = vld [vmem:[#allocation7 + $0xb0] sm:$0xff]  ;;  %v903_v12 = vld [vmem:[#allocation7 + $0xa8] sm:$0xff] }
  0x7a   : > { %2649 = vmatprep.subr.mxu0 %v334_v25  ;;  %v936_v9 = vld [vmem:[#allocation7 + $0x1b0] sm:$0xff]  ;;  %2259 = vmatprep.subr.mxu1 %v904_v8  ;;  %v935_v13 = vld [vmem:[#allocation7 + $0x1a8] sm:$0xff]  ;;  %v902_v16 = vld [vmem:[#allocation7 + $0xa0] sm:$0xff] }
  0x7b   : > { %2650 = vmatpush3.msra.mxu0 %v334_v25  ;;  %v888_v10 = vld [vmem:[#allocation7 + $0x30] sm:$0xff]  ;;  %v887_v14 = vld [vmem:[#allocation7 + $0x28] sm:$0xff]  ;;  %v934_v17 = vld [vmem:[#allocation7 + $0x1a0] sm:$0xff] }
  0x7c   : > { %2651 = vmatprep.subr.mxu0 %v333_v28  ;;  %v920_v11 = vld [vmem:[#allocation7 + $0x130] sm:$0xff]  ;;  %2260 = vmatpush3.msra.mxu1 %v888_v10  ;;  %v919_v15 = vld [vmem:[#allocation7 + $0x128] sm:$0xff]  ;;  %v886_v18 = vld [vmem:[#allocation7 + $0x20] sm:$0xff] }
  0x7d   : > { %2652 = vmatpush3.msra.mxu0 %v333_v28  ;;  %2261 = vmatprep.subr.mxu1 %v903_v12  ;;  %v918_v19 = vld [vmem:[#allocation7 + $0x120] sm:$0xff]  ;;  %v901_v20 = vld [vmem:[#allocation7 + $0x98] sm:$0xff]  ;;  %v900_v24 = vld [vmem:[#allocation7 + $0x90] sm:$0xff] }
  0x7e   : > { %2653 = vmatprep.subr.mxu0 %v332_v31  ;;  %2262 = vmatpush3.msra.mxu1 %v887_v14  ;;  %v933_v21 = vld [vmem:[#allocation7 + $0x198] sm:$0xff]  ;;  %v932_v25 = vld [vmem:[#allocation7 + $0x190] sm:$0xff]  ;;  %v899_v28 = vld [vmem:[#allocation7 + $0x88] sm:$0xff] }
  0x7f   : > { %2654 = vmatpush3.msra.mxu0 %v332_v31  ;;  %2263 = vmatprep.subr.mxu1 %v902_v16  ;;  %v885_v22 = vld [vmem:[#allocation7 + $0x18] sm:$0xff]  ;;  %v884_v26 = vld [vmem:[#allocation7 + $0x10] sm:$0xff]  ;;  %v931_v29 = vld [vmem:[#allocation7 + $0x188] sm:$0xff] }
  0x80   : > { %2655 = vmatprep.subr.mxu0 %v331_v34  ;;  %2264 = vmatpush3.msra.mxu1 %v886_v18  ;;  %v917_v23 = vld [vmem:[#allocation7 + $0x118] sm:$0xff]  ;;  %v916_v27 = vld [vmem:[#allocation7 + $0x110] sm:$0xff]  ;;  %v883_v30 = vld [vmem:[#allocation7 + $0x8] sm:$0xff] }
  0x81   : > { %2656 = vmatpush3.msra.mxu0 %v331_v34  ;;  %2265 = vmatprep.subr.mxu1 %v901_v20  ;;  %v915_v31 = vld [vmem:[#allocation7 + $0x108] sm:$0xff]  ;;  %v898_v32 = vld [vmem:[#allocation7 + $0x80] sm:$0xff]  ;;  %vm3364_vm11 = vmneg %vm639_vm5 }
  0x82   : > { %2658 = vmatmul.mubr.f32.vlgmr.msra.gmra.mxu0 %v312_v35  ;;  %2321 = vmatprep.subr.mxu0 %v945_v36  ;;  %v930_v33 = vld [vmem:[#allocation7 + $0x180] sm:$0xff]  ;;  %v977_v36 = vld [vmem:[#allocation7 + $0x2f8] sm:$0xff] }
  0x83   : > { %2660 = vmatprep.mubr.f32.mxu0 %v313_v37  ;;  %2322 = vmatpush3.msra.mxu0 %v929_v38  ;;  %v882_v34 = vld [vmem:[#allocation7] sm:$0xff]  ;;  %v1009_v37 = vld [vmem:[#allocation7 + $0x3f8] sm:$0xff]  ;;  %v3342_v38 = vstv %s4284_s1  ;;  %s3148_s1 = smov [#allocation10]  }
  0x84   : > { %2323 = vmatprep.subr.mxu0 %v944_v39  ;;  %2266 = vmatpush3.msra.mxu1 %v885_v22  ;;  %v914_v35 = vld [vmem:[#allocation7 + $0x100] sm:$0xff]  ;;  %vm549_vm0 = vcmp.gt.s32.totalorder %v3342_v38, 0  ;;  %vm559_vm1 = vcmp.lt.s32.totalorder %v3342_v38, 17  ;;  %v961_v18 = vld [vmem:[#allocation7 + $0x278] sm:$0xff]  ;;  %s3042_s3 = sshll.u32 %s3148_s1, 4  ;;  %s3043_s3 = int_to_ptr.vmem [resolvable:$false] %s3042_s3 }
  0x85   : > { %2324 = vmatpush3.msra.mxu0 %v928_v40  ;;  %2267 = vmatprep.subr.mxu1 %v900_v24  ;;  %v3347_v39 = vld [vmem:[%s4258_s2] ss:$0 sm:$0xff]  ;;  %vm569_vm2 = vmand %vm549_vm0, %vm559_vm1  ;;  %s3044_s5 = scalar_lea.vmem %s3043_s3, 4096  ;;  %p3045_p8 = scmp.lt.s32.totalorder %s4199_s28, %s3043_s3 }
  0x86   : > { %2661 = vmatmul.mubr.f32.gmra.mxu0 %v314_v41  ;;  %2325 = vmatprep.subr.mxu0 %v943_v42  ;;  %v540_v41 = vadd.s32 1, %v3342_v38  ;;  %p3046_p10 = scmp.lt.s32.totalorder %s3044_s5, %s3038_s22 }
  0x87   : > { %2663 = vmatprep.mubr.f32.mxu0 %v315_v43  ;;  %2326 = vmatpush3.msra.mxu0 %v927_v44 }
  0x88   : > { %2327 = vmatprep.subr.mxu0 %v942_v45  ;;  %2268 = vmatpush3.msra.mxu1 %v884_v26  ;;  %vm550_vm3 = vcmp.gt.s32.totalorder %v540_v41, 0  ;;  %vm560_vm4 = vcmp.lt.s32.totalorder %v540_v41, 17  ;;  %p3047_p12 = por %p3046_p10, %p3045_p8 }
  0x89   : > { %2328 = vmatpush3.msra.mxu0 %v926_v46  ;;  %2269 = vmatprep.subr.mxu1 %v899_v28  ;;  %vm570_vm7 = vmand %vm550_vm3, %vm560_vm4  ;;  %v960_v28 = vld [vmem:[#allocation7 + $0x270] sm:$0xff] }
  0x8a   : > { %2664 = vmatmul.mubr.f32.gmra.mxu0 %v316_v47  ;;  %2329 = vmatprep.subr.mxu0 %v941_v48  ;;  %v541_v47 = vadd.s32 2, %v3342_v38  ;;  %p3048_p0 = pnand %p3047_p12, %p3041_p6 }
  0x8b   : > { %2666 = vmatprep.mubr.f32.mxu0 %v317_v49  ;;  %2330 = vmatpush3.msra.mxu0 %v925_v50 }
  0x8c   : > { %2331 = vmatprep.subr.mxu0 %v940_v51  ;;  %2270 = vmatpush3.msra.mxu1 %v883_v30  ;;  %vm551_vm8 = vcmp.gt.s32.totalorder %v541_v47, 0  ;;  %vm561_vm9 = vcmp.lt.s32.totalorder %v541_v47, 17  ;;  %v975_v47 = vld [vmem:[#allocation7 + $0x2e8] sm:$0xff] }
  0x8d   : > { %2332 = vmatpush3.msra.mxu0 %v924_v52  ;;  %2271 = vmatprep.subr.mxu1 %v898_v32  ;;  %vm3372_vm12 = vmand %vm551_vm8, %vm561_vm9 }
  0x8e   : > { %2667 = vmatmul.mubr.f32.gmra.mxu0 %v318_v53  ;;  %2333 = vmatprep.subr.mxu0 %v939_v54 }
  0x8f   : > { %2669 = vmatprep.mubr.f32.mxu0 %v319_v55  ;;  %2334 = vmatpush3.msra.mxu0 %v923_v56 }
  0x90   : > { %2335 = vmatprep.subr.mxu0 %v938_v57  ;;  %2272 = vmatpush3.msra.mxu1 %v882_v34 }
  0x91   : > { %2336 = vmatpush3.msra.mxu0 %v922_v58  ;;  %2401 = vmatprep.subr.mxu1 %v977_v36  ;;  %v542_v58 = vadd.s32 3, %v3342_v38 }
  0x92   : > { %2670 = vmatmul.mubr.f32.gmra.mxu0 %v320_v59  ;;  %2337 = vmatprep.subr.mxu0 %v937_v60 }
  0x93   : > { %2672 = vmatprep.mubr.f32.mxu0 %v321_v61  ;;  %2338 = vmatpush3.msra.mxu0 %v921_v7  ;;  %vm552_vm13 = vcmp.gt.s32.totalorder %v542_v58, 0  ;;  %vm562_vm14 = vcmp.lt.s32.totalorder %v542_v58, 17  ;;  %v1789_v7 = vld [vmem:[#allocation9 + $0x78] sm:$0xff] }
  0x94   : > { %2339 = vmatprep.subr.mxu0 %v936_v9  ;;  %vm3408_vm15 = vmand %vm552_vm13, %vm562_vm14 }
  0x95   : > { %2340 = vmatpush3.msra.mxu0 %v920_v11 }
  0x96   : > { %2673 = vmatmul.mubr.f32.gmra.mxu0 %v322_v62  ;;  %2341 = vmatprep.subr.mxu0 %v935_v13 }
  0x97   : > { %2675 = vmatprep.mubr.f32.mxu0 %v323_v63  ;;  %2342 = vmatpush3.msra.mxu0 %v919_v15 }
  0x98   : > { %2343 = vmatprep.subr.mxu0 %v934_v17 }
  0x99   : > { %2344 = vmatpush3.msra.mxu0 %v918_v19 }
  0x9a   : > { %2676 = vmatmul.mubr.f32.gmra.mxu0 %v324_v0  ;;  %2345 = vmatprep.subr.mxu0 %v933_v21 }
  0x9b   : > { %2678 = vmatprep.mubr.f32.mxu0 %v325_v1  ;;  %2346 = vmatpush3.msra.mxu0 %v917_v23 }
  0x9c   : > { %2347 = vmatprep.subr.mxu0 %v932_v25  ;;  %v976_v25 = vld [vmem:[#allocation7 + $0x2f0] sm:$0xff] }
  0x9d   : > { %2348 = vmatpush3.msra.mxu0 %v916_v27 }
  0x9e   : > { %2679 = vmatmul.mubr.f32.gmra.mxu0 %v326_v2  ;;  %2349 = vmatprep.subr.mxu0 %v931_v29 }
  0x9f   : > { %2681 = vmatprep.mubr.f32.mxu0 %v327_v3  ;;  %2350 = vmatpush3.msra.mxu0 %v915_v31 }
  0xa0   : > { %2351 = vmatprep.subr.mxu0 %v930_v33  ;;  %v993_v33 = vld [vmem:[#allocation7 + $0x378] sm:$0xff] }
  0xa1   : > { %2352 = vmatpush3.msra.mxu0 %v914_v35 }
  0xa2   : > { %2682 = vmatmul.mubr.f32.gmra.mxu0 %v328_v4  ;;  %2481 = vmatprep.subr.mxu0 %v1009_v37 }
  0xa3   : > { %2684 = vmatprep.mubr.f32.mxu0 %v329_v5 }
  0xa6   : > { %2685 = vmatmul.mubr.f32.gmra.mxu0 %v330_v6 }
 0x142   : > { %v2659_v40 = vpop.f32.mrf.mxu0 }
 0x143   : > { %v426_v42 = vadd.f32 %v2659_v40, %v3347_v39 }
 0x144   : > { %v420_v43 = vpop.f32.mrf.mxu0 }
 0x145   : > { %v520_v44 = vmax.f32 %v426_v42, 0.0  ;;  %v421_v45 = vadd.f32 %v3347_v39, %v420_v43  ;;  %v543_v42 = vadd.s32 4, %v3342_v38 }
 0x146   : > { %v2662_v46 = vpop.f32.mrf.mxu0 }
 0x147   : > { %v600_v48 = vsel %vm569_vm2, %v520_v44, 0.0  ;;  %v519_v49 = vmax.f32 %v421_v45, 0.0  ;;  %v436_v50 = vadd.f32 %v2662_v46, %v3347_v39  ;;  %vm553_vm0 = vcmp.gt.s32.totalorder %v543_v42, 0 }
 0x148   : > { %v641_v51 = vrot.slane %v600_v48, 7  ;;  %v430_v52 = vpop.f32.mrf.mxu0  ;;  %vm563_vm1 = vcmp.lt.s32.totalorder %v543_v42, 17 }
 0x149   : > { %v599_v53 = vsel %vm569_vm2, %v519_v49, 0.0  ;;  %v522_v54 = vmax.f32 %v436_v50, 0.0  ;;  %v431_v55 = vadd.f32 %v3347_v39, %v430_v52  ;;  %v1008_v50 = vld [vmem:[#allocation7 + $0x3f0] sm:$0xff]  ;;  %v959_v52 = vld [vmem:[#allocation7 + $0x268] sm:$0xff]  ;;  %vm3466_vm2 = vmand %vm553_vm0, %vm563_vm1 }
 0x14a   : > { %v640_v56 = vrot.slane %v599_v53, 7  ;;  %v2665_v57 = vpop.f32.mrf.mxu0  ;;  %v710_v62 = vsel %vm639_vm5, %v641_v51, 0.0 }
 0x14b   : > { %v602_v59 = vsel %vm570_vm7, %v522_v54, 0.0  ;;  %v521_v60 = vmax.f32 %v431_v55, 0.0  ;;  %v446_v61 = vadd.f32 %v2665_v57, %v3347_v39  ;;  %v740_v19 = vrot.slane %v710_v62, 1  ;;  %v992_v57 = vld [vmem:[#allocation7 + $0x370] sm:$0xff] }
 0x14c   : > { %v644_v63 = vrot.slane %v602_v59, 7  ;;  %v440_v0 = vpop.f32.mrf.mxu0  ;;  %v642_v1 = vsel %vm639_vm5, %v640_v56, %v641_v51  ;;  %v700_v2 = vsel %vm639_vm5, 0.0, %v640_v56  ;;  %v797_v26 = vrot.slane %v710_v62, 2 }
 0x14d   : > { %v601_v3 = vsel %vm570_vm7, %v521_v60, 0.0  ;;  %v524_v4 = vmax.f32 %v446_v61, 0.0  ;;  %v441_v5 = vadd.f32 %v3347_v39, %v440_v0  ;;  %v737_v6 = vrot.slane %v700_v2, 1 }
 0x14e   : > { %v3368_v8 = vrot.slane %v601_v3, 7  ;;  %v738_v10 = vrot.slane %v642_v1, 1  ;;  %v794_v11 = vrot.slane %v700_v2, 2  ;;  %v2668_v12 = vpop.f32.mrf.mxu0  ;;  %v795_v15 = vrot.slane %v642_v1, 2  ;;  %v974_v2 = vld [vmem:[#allocation7 + $0x2e0] sm:$0xff]  ;;  %v1007_v3 = vld [vmem:[#allocation7 + $0x3e8] sm:$0xff] }
 0x14f   : > { %v3378_v13 = vsel %vm3372_vm12, %v524_v4, 0.0  ;;  %v523_v14 = vmax.f32 %v441_v5, 0.0  ;;  %v456_v16 = vadd.f32 %v2668_v12, %v3347_v39  ;;  %v711_v34 = vsel %vm639_vm5, %v644_v63, 0.0  ;;  %v958_v5 = vld [vmem:[#allocation7 + $0x260] sm:$0xff] }
 0x150   : > { %v739_v17 = vsel %vm736_vm6, %v737_v6, %v738_v10  ;;  %2163 = vmatprep.mubr.msk.f32.mxu0 %vm3364_vm11, %v3368_v8  ;;  %v3387_v20 = vsel %vm639_vm5, %v3368_v8, %v644_v63  ;;  %v450_v21 = vpop.f32.mrf.mxu0  ;;  %v647_v22 = vrot.slane %v3378_v13, 7  ;;  %v796_v24 = vsel %vm793_vm10, %v794_v11, %v795_v15 }
 0x151   : > { %v603_v23 = vsel %vm3372_vm12, %v523_v14, 0.0  ;;  %1097 = vmatprep.mubr.f32.mxu1 %v739_v17  ;;  %1243 = vmatmul.mubr.f32.vlgmr.msra.gmra.mxu0 %v796_v24  ;;  %v741_v27 = vsel %vm736_vm6, %v738_v10, %v740_v19  ;;  %v526_v29 = vmax.f32 %v456_v16, 0.0  ;;  %v701_v30 = vsel %vm639_vm5, 0.0, %v3368_v8  ;;  %v991_v10 = vld [vmem:[#allocation7 + $0x368] sm:$0xff]  ;;  %v973_v16 = vld [vmem:[#allocation7 + $0x2d8] sm:$0xff] }
 0x152   : > { %2147 = vmatmul.mubr.msk.f32.vlgmr.msra.gmra.mxu1 %vm3364_vm11, %v640_v56  ;;  %v743_v31 = vrot.slane %v3387_v20, 1  ;;  %v2671_v32 = vpop.f32.mrf.mxu0  ;;  %v3400_v35 = vrot.slane %v603_v23, 7  ;;  %v742_v36 = vrot.slane %v701_v30, 1  ;;  %v451_v37 = vadd.f32 %v3347_v39, %v450_v21  ;;  %1247 = vmatprep.mubr.f32.mxu0 %v3387_v20  ;;  %v957_v24 = vld [vmem:[#allocation7 + $0x258] sm:$0xff] }
 0x153   : > { %2402 = vmatpush3.msra.mxu1 %v961_v18  ;;  %1102 = vmatprep.mubr.f32.mxu1 %v741_v27  ;;  %v798_v40 = vsel %vm793_vm10, %v795_v15, %v797_v26  ;;  %v799_v41 = vrot.slane %v701_v30, 2  ;;  %v800_v48 = vrot.slane %v3387_v20, 2  ;;  %v3424_v51 = vsel %vm3408_vm15, %v526_v29, 0.0  ;;  %v990_v29 = vld [vmem:[#allocation7 + $0x360] sm:$0xff] }
 0x154   : > { %2403 = vmatprep.subr.mxu1 %v976_v25  ;;  %v460_v43 = vpop.f32.mrf.mxu0  ;;  %v3413_v45 = vsel %vm736_vm6, %v742_v36, %v743_v31  ;;  %v525_v46 = vmax.f32 %v451_v37, 0.0  ;;  %v3420_v49 = vsel %vm639_vm5, %v3400_v35, %v647_v22  ;;  %2482 = vmatpush3.msra.mxu0 %v993_v33  ;;  %v745_v53 = vrot.slane %v711_v34, 1 }
 0x155   : > { %2404 = vmatpush3.msra.mxu1 %v960_v28  ;;  %1248 = vmatmul.mubr.f32.gmra.mxu0 %v798_v40  ;;  %v466_v54 = vadd.f32 %v2671_v32, %v3347_v39  ;;  %v3429_v55 = vsel %vm639_vm5, 0.0, %v3400_v35  ;;  %v802_v58 = vrot.slane %v711_v34, 2  ;;  %v748_v61 = vrot.slane %v3420_v49, 1  ;;  %v972_v40 = vld [vmem:[#allocation7 + $0x2d0] sm:$0xff] }
 0x156   : > { %1103 = vmatmul.mubr.f32.gmra.mxu1 %v642_v1  ;;  %v2674_v56 = vpop.f32.mrf.mxu0  ;;  %2165 = vmatprep.mubr.msk.f32.mxu0 %vm3364_vm11, %v3400_v35  ;;  %v605_v59 = vsel %vm3408_vm15, %v525_v46, 0.0  ;;  %v747_v60 = vrot.slane %v3429_v55, 1  ;;  %v461_v62 = vadd.f32 %v3347_v39, %v460_v43  ;;  %v650_v0 = vrot.slane %v3424_v51, 7  ;;  %v956_v43 = vld [vmem:[#allocation7 + $0x250] sm:$0xff]  ;;  %v989_v46 = vld [vmem:[#allocation7 + $0x358] sm:$0xff] }
 0x157   : > { %1107 = vmatprep.mubr.f32.mxu1 %v3413_v45  ;;  %2405 = vmatprep.subr.mxu1 %v975_v47  ;;  %v3442_v1 = vsel %vm793_vm10, %v799_v41, %v800_v48  ;;  %v3449_v4 = vsel %vm736_vm6, %v743_v31, %v745_v53  ;;  %v528_v6 = vmax.f32 %v466_v54, 0.0  ;;  %v712_v11 = vsel %vm639_vm5, %v647_v22, 0.0  ;;  %v1006_v22 = vld [vmem:[#allocation7 + $0x3e0] sm:$0xff]  ;;  %v1005_v41 = vld [vmem:[#allocation7 + $0x3d8] sm:$0xff] }
 0x158   : > { %v470_v63 = vpop.f32.mrf.mxu0  ;;  %2483 = vmatprep.subr.mxu0 %v1008_v50  ;;  %2406 = vmatpush3.msra.mxu1 %v959_v52  ;;  %v3454_v12 = vrot.slane %v605_v59, 7  ;;  %v3464_v14 = vsel %vm736_vm6, %v747_v60, %v748_v61  ;;  %v527_v15 = vmax.f32 %v461_v62, 0.0  ;;  %v804_v17 = vrot.slane %v3429_v55, 2  ;;  %v1004_v62 = vld [vmem:[#allocation7 + $0x3d0] sm:$0xff] }
 0x159   : > { %2484 = vmatpush3.msra.mxu0 %v992_v57  ;;  %2407 = vmatprep.subr.mxu1 %v974_v2  ;;  %v805_v18 = vrot.slane %v3420_v49, 2  ;;  %v3486_v23 = vsel %vm3466_vm2, %v528_v6, 0.0  ;;  %v750_v25 = vrot.slane %v712_v11, 1  ;;  %v476_v26 = vadd.f32 %v2674_v56, %v3347_v39  ;;  %v971_v57 = vld [vmem:[#allocation7 + $0x2c8] sm:$0xff] }
 0x15a   : > { %2149 = vmatmul.mubr.msk.f32.gmra.mxu1 %vm3364_vm11, %v3368_v8  ;;  %1253 = vmatmul.mubr.f32.gmra.mxu0 %v3442_v1  ;;  %v2677_v9 = vpop.f32.mrf.mxu0  ;;  %v3459_v8 = vsel %vm793_vm10, %v800_v48, %v802_v58  ;;  %v3476_v19 = vsel %vm639_vm5, %v3454_v12, %v650_v0  ;;  %v3480_v21 = vsel %vm639_vm5, 0.0, %v3454_v12  ;;  %v544_v27 = vadd.s32 5, %v3342_v38 }
 0x15b   : > { %1112 = vmatprep.mubr.f32.mxu1 %v3449_v4  ;;  %1257 = vmatprep.mubr.f32.mxu0 %v3420_v49  ;;  %v607_v30 = vsel %vm3466_vm2, %v527_v15, 0.0  ;;  %v752_v31 = vrot.slane %v3480_v21, 1  ;;  %v753_v32 = vrot.slane %v3476_v19, 1  ;;  %v471_v33 = vadd.f32 %v3347_v39, %v470_v63 }
 0x15c   : > { %2485 = vmatprep.subr.mxu0 %v1007_v3  ;;  %2408 = vmatpush3.msra.mxu1 %v958_v5  ;;  %v480_v28 = vpop.f32.mrf.mxu0  ;;  %v653_v36 = vrot.slane %v3486_v23, 7  ;;  %v3503_v37 = vsel %vm793_vm10, %v804_v17, %v805_v18  ;;  %v3512_v42 = vsel %vm736_vm6, %v748_v61, %v750_v25  ;;  %v530_v44 = vmax.f32 %v476_v26, 0.0  ;;  %v988_v5 = vld [vmem:[#allocation7 + $0x350] sm:$0xff]  ;;  %v987_v26 = vld [vmem:[#allocation7 + $0x348] sm:$0xff] }
 0x15d   : > { %2486 = vmatpush3.msra.mxu0 %v991_v10  ;;  %2409 = vmatprep.subr.mxu1 %v973_v16  ;;  %vm554_vm3 = vcmp.gt.s32.totalorder %v544_v27, 0  ;;  %vm564_vm4 = vcmp.lt.s32.totalorder %v544_v27, 17  ;;  %v3517_v47 = vsel %vm639_vm5, %v650_v0, 0.0  ;;  %v3519_v48 = vrot.slane %v607_v30, 7  ;;  %v955_v0 = vld [vmem:[#allocation7 + $0x248] sm:$0xff] }
 0x15e   : > { %1113 = vmatmul.mubr.f32.gmra.mxu1 %v3387_v20  ;;  %1258 = vmatmul.mubr.f32.gmra.mxu0 %v3459_v8  ;;  %v807_v20 = vrot.slane %v712_v11, 2  ;;  %v3499_v34 = vpop.f32.mrf.mxu0  ;;  %v545_v50 = vadd.s32 6, %v3342_v38  ;;  %v3530_v53 = vsel %vm736_vm6, %v752_v31, %v753_v32  ;;  %v529_v51 = vmax.f32 %v471_v33, 0.0  ;;  %vm3537_vm7 = vmand %vm554_vm3, %vm564_vm4 }
 0x15f   : > { %1117 = vmatprep.mubr.f32.mxu1 %v3464_v14  ;;  %2167 = vmatprep.mubr.msk.f32.mxu0 %vm3364_vm11, %v3454_v12  ;;  %v486_v54 = vadd.f32 %v2677_v9, %v3347_v39  ;;  %v809_v58 = vrot.slane %v3480_v21, 2  ;;  %v810_v59 = vrot.slane %v3476_v19, 2  ;;  %v3547_v60 = vsel %vm639_vm5, %v3519_v48, %v653_v36  ;;  %v1003_v21 = vld [vmem:[#allocation7 + $0x3c8] sm:$0xff] }
 0x160   : > { %2487 = vmatprep.subr.mxu0 %v1006_v22  ;;  %2410 = vmatpush3.msra.mxu1 %v957_v24  ;;  %v3525_v52 = vsel %vm793_vm10, %v805_v18, %v807_v20  ;;  %v3533_v55 = vpop.f32.mrf.mxu0  ;;  %v3551_v61 = vsel %vm639_vm5, 0.0, %v3519_v48  ;;  %v3557_v63 = vsel %vm3537_vm7, %v530_v44, 0.0  ;;  %v755_v2 = vrot.slane %v3517_v47, 1  ;;  %v970_v18 = vld [vmem:[#allocation7 + $0x2c0] sm:$0xff] }
 0x161   : > { %2488 = vmatpush3.msra.mxu0 %v990_v29  ;;  %2411 = vmatprep.subr.mxu1 %v972_v40  ;;  %v481_v3 = vadd.f32 %v3347_v39, %v480_v28  ;;  %v812_v9 = vrot.slane %v3517_v47, 2  ;;  %vm555_vm8 = vcmp.gt.s32.totalorder %v545_v50, 0  ;;  %vm565_vm9 = vcmp.lt.s32.totalorder %v545_v50, 17  ;;  %v954_v24 = vld [vmem:[#allocation7 + $0x240] sm:$0xff] }
 0x162   : > { %2151 = vmatmul.mubr.msk.f32.gmra.mxu1 %vm3364_vm11, %v3400_v35  ;;  %1263 = vmatmul.mubr.f32.gmra.mxu0 %v3503_v37  ;;  %v3561_v6 = vpop.f32.mrf.mxu0  ;;  %v609_v10 = vsel %vm3537_vm7, %v529_v51, 0.0  ;;  %v532_v11 = vmax.f32 %v486_v54, 0.0  ;;  %v757_v15 = vrot.slane %v3551_v61, 1  ;;  %v758_v13 = vrot.slane %v3547_v60, 1  ;;  %vm3598_vm12 = vmand %vm555_vm8, %vm565_vm9  ;;  %v1002_v50 = vld [vmem:[#allocation7 + $0x3c0] sm:$0xff]  ;;  %v953_v51 = vld [vmem:[#allocation7 + $0x238] sm:$0xff] }
 0x163   : > { %1122 = vmatprep.mubr.f32.mxu1 %v3512_v42  ;;  %1267 = vmatprep.mubr.f32.mxu0 %v3476_v19  ;;  %v656_v16 = vrot.slane %v3557_v63, 7  ;;  %v3574_v17 = vsel %vm793_vm10, %v809_v58, %v810_v59  ;;  %v3583_v22 = vsel %vm736_vm6, %v753_v32, %v755_v2  ;;  %v531_v25 = vmax.f32 %v481_v3, 0.0  ;;  %v986_v58 = vld [vmem:[#allocation7 + $0x340] sm:$0xff] }
 0x164   : > { %2489 = vmatprep.subr.mxu0 %v1005_v41  ;;  %2412 = vmatpush3.msra.mxu1 %v956_v43  ;;  %v3585_v27 = vpop.f32.mrf.mxu0  ;;  %v3590_v28 = vsel %vm639_vm5, %v653_v36, 0.0  ;;  %v3592_v29 = vrot.slane %v609_v10, 7  ;;  %v546_v30 = vadd.s32 7, %v3342_v38  ;;  %v3604_v31 = vadd.s32 9, %v3342_v38  ;;  %v969_v41 = vld [vmem:[#allocation7 + $0x2b8] sm:$0xff] }
 0x165   : > { %2490 = vmatpush3.msra.mxu0 %v989_v46  ;;  %2413 = vmatprep.subr.mxu1 %v971_v57  ;;  %v3607_v23 = vsel %vm793_vm10, %v810_v59, %v812_v9  ;;  %v3611_v32 = vsel %vm3598_vm12, %v532_v11, 0.0  ;;  %v3616_v33 = vsel %vm736_vm6, %v757_v15, %v758_v13  ;;  %v496_v36 = vadd.f32 %v3499_v34, %v3347_v39  ;;  %v1001_v9 = vld [vmem:[#allocation7 + $0x3b8] sm:$0xff]  ;;  %v952_v11 = vld [vmem:[#allocation7 + $0x230] sm:$0xff] }
 0x166   : > { %1123 = vmatmul.mubr.f32.gmra.mxu1 %v3420_v49  ;;  %1268 = vmatmul.mubr.f32.gmra.mxu0 %v3525_v52  ;;  %v2686_v40 = vpop.f32.mrf.mxu0  ;;  %v814_v43 = vrot.slane %v3551_v61, 2  ;;  %v815_v44 = vrot.slane %v3547_v60, 2  ;;  %v3624_v46 = vsel %vm639_vm5, %v3592_v29, %v656_v16  ;;  %v3628_v47 = vsel %vm639_vm5, 0.0, %v3592_v29 }
 0x167   : > { %1127 = vmatprep.mubr.f32.mxu1 %v3530_v53  ;;  %2169 = vmatprep.mubr.msk.f32.mxu0 %vm3364_vm11, %v3519_v48  ;;  %v611_v34 = vsel %vm3598_vm12, %v531_v25, 0.0  ;;  %v760_v54 = vrot.slane %v3590_v28, 1  ;;  %v491_v56 = vadd.f32 %v3347_v39, %v3533_v55  ;;  %v3638_v57 = vadd.s32 8, %v3342_v38 }
 0x168   : > { %2491 = vmatprep.subr.mxu0 %v1004_v62  ;;  %2414 = vmatpush3.msra.mxu1 %v955_v0  ;;  %v659_v59 = vrot.slane %v3611_v32, 7  ;;  %vm556_vm13 = vcmp.gt.s32.totalorder %v546_v30, 0  ;;  %vm566_vm14 = vcmp.lt.s32.totalorder %v546_v30, 17  ;;  %vm558_vm15 = vcmp.gt.s32.totalorder %v3604_v31, 0  ;;  %v510_v63 = vpop.f32.mrf.mxu0 }
 0x169   : > { %2492 = vmatpush3.msra.mxu0 %v988_v5  ;;  %2415 = vmatprep.subr.mxu1 %v970_v18  ;;  %v817_v61 = vrot.slane %v3590_v28, 2  ;;  %v534_v55 = vmax.f32 %v496_v36, 0.0  ;;  %v762_v38 = vrot.slane %v3628_v47, 1  ;;  %v763_v62 = vrot.slane %v3624_v46, 1  ;;  %v968_v5 = vld [vmem:[#allocation7 + $0x2b0] sm:$0xff]  ;;  %vm3675_vm3 = vmand %vm556_vm13, %vm566_vm14 }
 0x16a   : > { %2153 = vmatmul.mubr.msk.f32.gmra.mxu1 %vm3364_vm11, %v3454_v12  ;;  %1273 = vmatmul.mubr.f32.gmra.mxu0 %v3574_v17  ;;  %v3650_v0 = vsel %vm639_vm5, %v656_v16, 0.0  ;;  %v3652_v2 = vrot.slane %v611_v34, 7  ;;  %v3655_v3 = vsel %vm793_vm10, %v814_v43, %v815_v44  ;;  %vm568_vm0 = vcmp.lt.s32.totalorder %v3604_v31, 17 }
 0x16b   : > { %1132 = vmatprep.mubr.f32.mxu1 %v3583_v22  ;;  %1277 = vmatprep.mubr.f32.mxu0 %v3547_v60  ;;  %v3665_v10 = vsel %vm736_vm6, %v758_v13, %v760_v54  ;;  %v533_v15 = vmax.f32 %v491_v56, 0.0  ;;  %v819_v16 = vrot.slane %v3628_v47, 2  ;;  %v820_v18 = vrot.slane %v3624_v46, 2  ;;  %vm3704_vm4 = vmand %vm558_vm15, %vm568_vm0  ;;  %v1000_v47 = vld [vmem:[#allocation7 + $0x3b0] sm:$0xff]  ;;  %v951_v54 = vld [vmem:[#allocation7 + $0x228] sm:$0xff] }
 0x16c   : > { %2493 = vmatprep.subr.mxu0 %v1003_v21  ;;  %2416 = vmatpush3.msra.mxu1 %v954_v24  ;;  %vm557_vm1 = vcmp.gt.s32.totalorder %v3638_v57, 0  ;;  %vm567_vm2 = vcmp.lt.s32.totalorder %v3638_v57, 17  ;;  %v985_v21 = vld [vmem:[#allocation7 + $0x338] sm:$0xff]  ;;  %v3681_v24 = vsel %vm639_vm5, %v3652_v2, %v659_v59  ;;  %v3685_v25 = vsel %vm639_vm5, 0.0, %v3652_v2 }
 0x16d   : > { %2494 = vmatpush3.msra.mxu0 %v987_v26  ;;  %2417 = vmatprep.subr.mxu1 %v969_v41  ;;  %v516_v26 = vadd.f32 %v2686_v40, %v3347_v39  ;;  %v511_v28 = vadd.f32 %v3347_v39, %v510_v63  ;;  %v3690_v20 = vsel %vm793_vm10, %v815_v44, %v817_v61  ;;  %v3694_v30 = vsel %vm3675_vm3, %v534_v55, 0.0  ;;  %v967_v41 = vld [vmem:[#allocation7 + $0x2a8] sm:$0xff]  ;;  %vm3773_vm7 = vmand %vm557_vm1, %vm567_vm2 }
 0x16e   : > { %1133 = vmatmul.mubr.f32.gmra.mxu1 %v3476_v19  ;;  %1278 = vmatmul.mubr.f32.gmra.mxu0 %v3607_v23  ;;  %v3697_v32 = vsel %vm736_vm6, %v762_v38, %v763_v62  ;;  %v765_v36 = vrot.slane %v3650_v0, 1  ;;  %v822_v43 = vrot.slane %v3650_v0, 2  ;;  %v3711_v44 = vadd.f32 %v3561_v6, %v3347_v39 }
 0x16f   : > { %1137 = vmatprep.mubr.f32.mxu1 %v3616_v33  ;;  %2171 = vmatprep.mubr.msk.f32.mxu0 %vm3364_vm11, %v3592_v29  ;;  %v537_v34 = vmax.f32 %v511_v28, 0.0  ;;  %v613_v31 = vsel %vm3675_vm3, %v533_v15, 0.0  ;;  %v767_v56 = vrot.slane %v3685_v25, 1  ;;  %v768_v6 = vrot.slane %v3681_v24, 1  ;;  %v966_v15 = vld [vmem:[#allocation7 + $0x2a0] sm:$0xff] }
 0x170   : > { %2495 = vmatprep.subr.mxu0 %v1002_v50  ;;  %2418 = vmatpush3.msra.mxu1 %v953_v51  ;;  %v538_v50 = vmax.f32 %v516_v26, 0.0  ;;  %v3714_v51 = vsel %vm639_vm5, %v659_v59, 0.0  ;;  %v662_v61 = vrot.slane %v3694_v30, 7  ;;  %v3728_v59 = vsel %vm793_vm10, %v819_v16, %v820_v18  ;;  %v963_v30 = vld [vmem:[#allocation7 + $0x288] sm:$0xff] }
 0x171   : > { %2496 = vmatpush3.msra.mxu0 %v986_v58  ;;  %2419 = vmatprep.subr.mxu1 %v968_v5  ;;  %v984_v58 = vld [vmem:[#allocation7 + $0x330] sm:$0xff]  ;;  %v617_v38 = vsel %vm3704_vm4, %v537_v34, 0.0  ;;  %v3735_v63 = vsel %vm736_vm6, %v763_v62, %v765_v36  ;;  %v501_v0 = vadd.f32 %v3347_v39, %v3585_v27  ;;  %v3744_v16 = vsel %vm793_vm10, %v820_v18, %v822_v43  ;;  %v999_v62 = vld [vmem:[#allocation7 + $0x3a8] sm:$0xff]  ;;  %v950_v39 = vld [vmem:[#allocation7 + $0x220] sm:$0xff] }
 0x172   : > { %2155 = vmatmul.mubr.msk.f32.gmra.mxu1 %vm3364_vm11, %v3519_v48  ;;  %1283 = vmatmul.mubr.f32.gmra.mxu0 %v3655_v3  ;;  %v618_v55 = vsel %vm3704_vm4, %v538_v50, 0.0  ;;  %v824_v13 = vrot.slane %v3685_v25, 2  ;;  %v3755_v27 = vsel %vm736_vm6, %v767_v56, %v768_v6  ;;  %v983_v18 = vld [vmem:[#allocation7 + $0x328] sm:$0xff] }
 0x173   : > { %1142 = vmatprep.mubr.f32.mxu1 %v3665_v10  ;;  %1287 = vmatprep.mubr.f32.mxu0 %v3624_v46  ;;  %v668_v5 = vrot.slane %v618_v55, 7  ;;  %v998_v55 = vld [vmem:[#allocation7 + $0x3a0] sm:$0xff] }
 0x174   : > { %2497 = vmatprep.subr.mxu0 %v1001_v9  ;;  %2420 = vmatpush3.msra.mxu1 %v952_v11  ;;  %v3739_v9 = vrot.slane %v617_v38, 7  ;;  %v3741_v11 = vrot.slane %v613_v31, 7 }
 0x175   : > { %2498 = vmatpush3.msra.mxu0 %v985_v21  ;;  %2421 = vmatprep.subr.mxu1 %v967_v41  ;;  %v536_v21 = vmax.f32 %v3711_v44, 0.0  ;;  %v719_v26 = vsel %vm639_vm5, %v668_v5, 0.0  ;;  %v535_v44 = vmax.f32 %v501_v0, 0.0  ;;  %v949_v0 = vld [vmem:[#allocation7 + $0x218] sm:$0xff] }
 0x176   : > { %1143 = vmatmul.mubr.f32.gmra.mxu1 %v3547_v60  ;;  %1288 = vmatmul.mubr.f32.gmra.mxu0 %v3690_v20  ;;  %v3760_v25 = vsel %vm639_vm5, %v3739_v9, %v668_v5  ;;  %v709_v28 = vsel %vm639_vm5, 0.0, %v3739_v9  ;;  %v871_v41 = vrot.slane %v719_v26, 1  ;;  %v878_v34 = vrot.slane %v719_v26, 2 }
 0x177   : > { %1147 = vmatprep.mubr.f32.mxu1 %v3697_v32  ;;  %2173 = vmatprep.mubr.msk.f32.mxu0 %vm3364_vm11, %v3652_v2  ;;  %v868_v36 = vrot.slane %v709_v28, 1  ;;  %v869_v40 = vrot.slane %v3760_v25, 1  ;;  %v875_v43 = vrot.slane %v709_v28, 2  ;;  %v876_v50 = vrot.slane %v3760_v25, 2 }
 0x178   : > { %2499 = vmatprep.subr.mxu0 %v1000_v47  ;;  %2422 = vmatpush3.msra.mxu1 %v951_v54  ;;  %v825_v47 = vrot.slane %v3681_v24, 2  ;;  %v965_v54 = vld [vmem:[#allocation7 + $0x298] sm:$0xff]  ;;  %v3781_v56 = vsel %vm639_vm5, %v3741_v11, %v662_v61  ;;  %v770_v5 = vrot.slane %v3714_v51, 1 }
 0x179   : > { %2500 = vmatpush3.msra.mxu0 %v984_v58  ;;  %2423 = vmatprep.subr.mxu1 %v966_v15  ;;  %v707_v58 = vsel %vm639_vm5, 0.0, %v3741_v11  ;;  %v3786_v38 = vsel %vm736_vm6, %v868_v36, %v869_v40  ;;  %v3789_v57 = vsel %vm736_vm6, %v869_v40, %v871_v41  ;;  %v982_v15 = vld [vmem:[#allocation7 + $0x320] sm:$0xff]  ;;  %v773_v28 = vrot.slane %v3781_v56, 1  ;;  %v964_v41 = vld [vmem:[#allocation7 + $0x290] sm:$0xff] }
 0x17a   : > { %2157 = vmatmul.mubr.msk.f32.gmra.mxu1 %vm3364_vm11, %v3592_v29  ;;  %1293 = vmatmul.mubr.f32.gmra.mxu0 %v3728_v59  ;;  %v772_v26 = vrot.slane %v707_v58, 1  ;;  %v3809_v36 = vsel %vm3773_vm7, %v536_v21, 0.0  ;;  %v3812_v40 = vsel %vm793_vm10, %v824_v13, %v825_v47  ;;  %v3822_v21 = vsel %vm736_vm6, %v768_v6, %v770_v5  ;;  %v981_v13 = vld [vmem:[#allocation7 + $0x318] sm:$0xff]  ;;  %v947_v5 = vld [vmem:[#allocation7 + $0x208] sm:$0xff] }
 0x17b   : > { %1152 = vmatprep.mubr.f32.mxu1 %v3735_v63  ;;  %1297 = vmatprep.mubr.f32.mxu0 %v3681_v24  ;;  %v665_v31 = vrot.slane %v3809_v36, 7 }
 0x17c   : > { %2501 = vmatprep.subr.mxu0 %v999_v62  ;;  %2424 = vmatpush3.msra.mxu1 %v950_v39  ;;  %v3795_v62 = vsel %vm793_vm10, %v875_v43, %v876_v50  ;;  %v3798_v39 = vsel %vm793_vm10, %v876_v50, %v878_v34  ;;  %v827_v43 = vrot.slane %v3714_v51, 2  ;;  %v997_v50 = vld [vmem:[#allocation7 + $0x398] sm:$0xff]  ;;  %v717_v34 = vsel %vm639_vm5, %v662_v61, 0.0 }
 0x17d   : > { %2502 = vmatpush3.msra.mxu0 %v983_v18  ;;  %v615_v18 = vsel %vm3773_vm7, %v535_v44, 0.0  ;;  %2425 = vmatprep.subr.mxu1 %v965_v54  ;;  %v948_v44 = vld [vmem:[#allocation7 + $0x210] sm:$0xff]  ;;  %v3833_v54 = vsel %vm736_vm6, %v772_v26, %v773_v28  ;;  %v830_v61 = vrot.slane %v3781_v56, 2  ;;  %v962_v26 = vld [vmem:[#allocation7 + $0x280] sm:$0xff] }
 0x17e   : > { %1153 = vmatmul.mubr.f32.gmra.mxu1 %v3624_v46  ;;  %1298 = vmatmul.mubr.f32.gmra.mxu0 %v3744_v16  ;;  %v3827_v51 = vrot.slane %v615_v18, 7  ;;  %v3836_v6 = vsel %vm793_vm10, %v825_v47, %v827_v43  ;;  %v980_v18 = vld [vmem:[#allocation7 + $0x310] sm:$0xff]  ;;  %v995_v43 = vld [vmem:[#allocation7 + $0x388] sm:$0xff] }
 0x17f   : > { %1157 = vmatprep.mubr.f32.mxu1 %v3755_v27  ;;  %2175 = vmatprep.mubr.msk.f32.mxu0 %vm3364_vm11, %v3741_v11 }
 0x180   : > { %2503 = vmatprep.subr.mxu0 %v998_v55  ;;  %2426 = vmatpush3.msra.mxu1 %v949_v0  ;;  %v829_v55 = vrot.slane %v707_v58, 2  ;;  %v996_v0 = vld [vmem:[#allocation7 + $0x390] sm:$0xff]  ;;  %v3849_v47 = vsel %vm639_vm5, %v3827_v51, %v665_v31 }
 0x181   : > { %2504 = vmatpush3.msra.mxu0 %v982_v15  ;;  %2427 = vmatprep.subr.mxu1 %v964_v41  ;;  %v775_v15 = vrot.slane %v717_v34, 1  ;;  %v832_v41 = vrot.slane %v717_v34, 2 }
 0x182   : > { %2159 = vmatmul.mubr.msk.f32.gmra.mxu1 %vm3364_vm11, %v3652_v2  ;;  %1303 = vmatmul.mubr.f32.gmra.mxu0 %v3812_v40  ;;  %v3852_v58 = vsel %vm793_vm10, %v829_v55, %v830_v61  ;;  %v1025_v55 = vld [vmem:[#allocation7 + $0x478] sm:$0xff] }
 0x183   : > { %1162 = vmatprep.mubr.f32.mxu1 %v3822_v21  ;;  %1307 = vmatprep.mubr.f32.mxu0 %v3781_v56  ;;  %v3864_v34 = vsel %vm793_vm10, %v830_v61, %v832_v41 }
 0x184   : > { %2505 = vmatprep.subr.mxu0 %v997_v50  ;;  %2428 = vmatpush3.msra.mxu1 %v948_v44  ;;  %v3859_v50 = vsel %vm736_vm6, %v773_v28, %v775_v15  ;;  %v946_v44 = vld [vmem:[#allocation7 + $0x200] sm:$0xff]  ;;  %v1775_v15 = vld [vmem:[#allocation9 + $0x8] sm:$0xff] }
 0x185   : > { %2506 = vmatpush3.msra.mxu0 %v981_v13  ;;  %2429 = vmatprep.subr.mxu1 %v963_v30  ;;  %v979_v13 = vld [vmem:[#allocation7 + $0x308] sm:$0xff]  ;;  %v994_v30 = vld [vmem:[#allocation7 + $0x380] sm:$0xff] }
 0x186   : > { %1163 = vmatmul.mubr.f32.gmra.mxu1 %v3681_v24  ;;  %1308 = vmatmul.mubr.f32.gmra.mxu0 %v3836_v6  ;;  %v978_v28 = vld [vmem:[#allocation7 + $0x300] sm:$0xff] }
 0x187   : > { %1167 = vmatprep.mubr.f32.mxu1 %v3833_v54  ;;  %2177 = vmatprep.mubr.msk.f32.mxu0 %vm3364_vm11, %v3827_v51 }
 0x188   : > { %2507 = vmatprep.subr.mxu0 %v996_v0  ;;  %2430 = vmatpush3.msra.mxu1 %v947_v5  ;;  %v1024_v0 = vld [vmem:[#allocation7 + $0x470] sm:$0xff] }
 0x189   : > { %2508 = vmatpush3.msra.mxu0 %v980_v18  ;;  %2431 = vmatprep.subr.mxu1 %v962_v26  ;;  %v1774_v26 = vld [vmem:[#allocation9] sm:$0xff] }
 0x18a   : > { %2161 = vmatmul.mubr.msk.f32.gmra.mxu1 %vm3364_vm11, %v3741_v11  ;;  %1313 = vmatmul.mubr.f32.gmra.mxu0 %v3852_v58 }
 0x18b   : > { %1172 = vmatprep.mubr.f32.mxu1 %v3859_v50  ;;  %1317 = vmatprep.mubr.f32.mxu0 %v3849_v47 }
 0x18c   : > { %2509 = vmatprep.subr.mxu0 %v995_v43  ;;  %2432 = vmatpush3.msra.mxu1 %v946_v44 }
 0x18d   : > { %2510 = vmatpush3.msra.mxu0 %v979_v13  ;;  %2687 = vmatprep.subr.mxu1 %v1025_v55 }
 0x18e   : > { %1173 = vmatmul.mubr.f32.gmra.mxu1 %v3781_v56  ;;  %1318 = vmatmul.mubr.f32.gmra.mxu0 %v3864_v34 }
 0x18f   : > { %1387 = vmatprep.mubr.f32.mxu1 %v3442_v1  ;;  %1532 = vmatprep.mubr.f32.mxu0 %v3464_v14  ;;  %v1023_v1 = vld [vmem:[#allocation7 + $0x468] sm:$0xff] }
 0x190   : > { %2511 = vmatprep.subr.mxu0 %v994_v30 }
 0x191   : > { %2512 = vmatpush3.msra.mxu0 %v978_v28 }
 0x192   : > { %1388 = vmatmul.mubr.f32.vlgmr.msra.gmra.mxu1 %v3413_v45  ;;  %2179 = vmatmul.mubr.msk.f32.vlgmr.msra.gmra.mxu0 %vm3364_vm11, %v3400_v35  ;;  %v1022_v45 = vld [vmem:[#allocation7 + $0x460] sm:$0xff]  ;;  %v1021_v35 = vld [vmem:[#allocation7 + $0x458] sm:$0xff] }
 0x193   : > { %2688 = vmatpush3.msra.mxu1 %v1025_v55  ;;  %1392 = vmatprep.mubr.f32.mxu1 %v3459_v8  ;;  %v1017_v8 = vld [vmem:[#allocation7 + $0x438] sm:$0xff] }
 0x194   : > { %1537 = vmatprep.mubr.f32.mxu0 %v3512_v42  ;;  %2689 = vmatprep.subr.mxu1 %v1024_v0 }
 0x195   : > { %2690 = vmatpush3.msra.mxu1 %v1024_v0  ;;  %2743 = vmatprep.subr.mxu0 %v1789_v7 }
 0x196   : > { %1393 = vmatmul.mubr.f32.gmra.mxu1 %v3449_v4  ;;  %1538 = vmatmul.mubr.f32.gmra.mxu0 %v3420_v49  ;;  %v1020_v49 = vld [vmem:[#allocation7 + $0x450] sm:$0xff]  ;;  %v1019_v4 = vld [vmem:[#allocation7 + $0x448] sm:$0xff] }
 0x197   : > { %1397 = vmatprep.mubr.f32.mxu1 %v3503_v37  ;;  %1542 = vmatprep.mubr.f32.mxu0 %v3530_v53 }
 0x198   : > { %2691 = vmatprep.subr.mxu1 %v1023_v1  ;;  %2744 = vmatpush3.msra.mxu0 %v1789_v7 }
 0x199   : > { %2692 = vmatpush3.msra.mxu1 %v1023_v1 }
 0x19a   : > { %1398 = vmatmul.mubr.f32.gmra.mxu1 %v3464_v14  ;;  %2181 = vmatmul.mubr.msk.f32.gmra.mxu0 %vm3364_vm11, %v3454_v12  ;;  %v1018_v12 = vld [vmem:[#allocation7 + $0x440] sm:$0xff]  ;;  %v1016_v14 = vld [vmem:[#allocation7 + $0x430] sm:$0xff] }
 0x19b   : > { %1402 = vmatprep.mubr.f32.mxu1 %v3525_v52  ;;  %1547 = vmatprep.mubr.f32.mxu0 %v3583_v22 }
 0x19c   : > { %2693 = vmatprep.subr.mxu1 %v1022_v45 }
 0x19d   : > { %2694 = vmatpush3.msra.mxu1 %v1022_v45 }
 0x19e   : > { %1403 = vmatmul.mubr.f32.gmra.mxu1 %v3512_v42  ;;  %1548 = vmatmul.mubr.f32.gmra.mxu0 %v3476_v19  ;;  %v1015_v19 = vld [vmem:[#allocation7 + $0x428] sm:$0xff]  ;;  %v708_v42 = vsel %vm639_vm5, 0.0, %v3827_v51 }
 0x19f   : > { %1407 = vmatprep.mubr.f32.mxu1 %v3574_v17  ;;  %1552 = vmatprep.mubr.f32.mxu0 %v3616_v33 }
 0x1a0   : > { %2695 = vmatprep.subr.mxu1 %v1021_v35 }
 0x1a1   : > { %2696 = vmatpush3.msra.mxu1 %v1021_v35 }
 0x1a2   : > { %1408 = vmatmul.mubr.f32.gmra.mxu1 %v3530_v53  ;;  %2183 = vmatmul.mubr.msk.f32.gmra.mxu0 %vm3364_vm11, %v3519_v48  ;;  %v1014_v48 = vld [vmem:[#allocation7 + $0x420] sm:$0xff]  ;;  %v852_v53 = vrot.slane %v708_v42, 1 }
 0x1a3   : > { %1412 = vmatprep.mubr.f32.mxu1 %v3607_v23  ;;  %1557 = vmatprep.mubr.f32.mxu0 %v3665_v10 }
 0x1a4   : > { %2697 = vmatprep.subr.mxu1 %v1020_v49 }
 0x1a5   : > { %2698 = vmatpush3.msra.mxu1 %v1020_v49 }
 0x1a6   : > { %1413 = vmatmul.mubr.f32.gmra.mxu1 %v3583_v22  ;;  %1558 = vmatmul.mubr.f32.gmra.mxu0 %v3547_v60  ;;  %v853_v60 = vrot.slane %v3849_v47, 1  ;;  %v718_v22 = vsel %vm639_vm5, %v665_v31, 0.0  ;;  %v1776_v31 = vld [vmem:[#allocation9 + $0x10] sm:$0xff] }
 0x1a7   : > { %1417 = vmatprep.mubr.f32.mxu1 %v3655_v3  ;;  %1562 = vmatprep.mubr.f32.mxu0 %v3697_v32 }
 0x1a8   : > { %2699 = vmatprep.subr.mxu1 %v1019_v4 }
 0x1a9   : > { %2700 = vmatpush3.msra.mxu1 %v1019_v4 }
 0x1aa   : > { %1418 = vmatmul.mubr.f32.gmra.mxu1 %v3616_v33  ;;  %2185 = vmatmul.mubr.msk.f32.gmra.mxu0 %vm3364_vm11, %v3592_v29  ;;  %v1013_v29 = vld [vmem:[#allocation7 + $0x418] sm:$0xff]  ;;  %v854_v33 = vsel %vm736_vm6, %v852_v53, %v853_v60 }
 0x1ab   : > { %1422 = vmatprep.mubr.f32.mxu1 %v3690_v20  ;;  %1567 = vmatprep.mubr.f32.mxu0 %v3735_v63 }
 0x1ac   : > { %2701 = vmatprep.subr.mxu1 %v1018_v12 }
 0x1ad   : > { %2702 = vmatpush3.msra.mxu1 %v1018_v12 }
 0x1ae   : > { %1423 = vmatmul.mubr.f32.gmra.mxu1 %v3665_v10  ;;  %1568 = vmatmul.mubr.f32.gmra.mxu0 %v3624_v46  ;;  %v855_v46 = vrot.slane %v718_v22, 1 }
 0x1af   : > { %1427 = vmatprep.mubr.f32.mxu1 %v3728_v59  ;;  %1572 = vmatprep.mubr.f32.mxu0 %v3755_v27 }
 0x1b0   : > { %2703 = vmatprep.subr.mxu1 %v1017_v8  ;;  %v856_v10 = vsel %vm736_vm6, %v853_v60, %v855_v46 }
 0x1b1   : > { %2704 = vmatpush3.msra.mxu1 %v1017_v8 }
 0x1b2   : > { %1428 = vmatmul.mubr.f32.gmra.mxu1 %v3697_v32  ;;  %2187 = vmatmul.mubr.msk.f32.gmra.mxu0 %vm3364_vm11, %v3652_v2  ;;  %v1012_v2 = vld [vmem:[#allocation7 + $0x410] sm:$0xff]  ;;  %v860_v32 = vrot.slane %v3849_v47, 2 }
 0x1b3   : > { %1432 = vmatprep.mubr.f32.mxu1 %v3744_v16  ;;  %1577 = vmatprep.mubr.f32.mxu0 %v3822_v21 }
 0x1b4   : > { %2705 = vmatprep.subr.mxu1 %v1016_v14 }
 0x1b5   : > { %2706 = vmatpush3.msra.mxu1 %v1016_v14 }
 0x1b6   : > { %1433 = vmatmul.mubr.f32.gmra.mxu1 %v3735_v63  ;;  %1578 = vmatmul.mubr.f32.gmra.mxu0 %v3681_v24  ;;  %v859_v24 = vrot.slane %v708_v42, 2  ;;  %v1011_v63 = vld [vmem:[#allocation7 + $0x408] sm:$0xff] }
 0x1b7   : > { %1437 = vmatprep.mubr.f32.mxu1 %v3812_v40  ;;  %1582 = vmatprep.mubr.f32.mxu0 %v3833_v54 }
 0x1b8   : > { %2707 = vmatprep.subr.mxu1 %v1015_v19 }
 0x1b9   : > { %2708 = vmatpush3.msra.mxu1 %v1015_v19 }
 0x1ba   : > { %1438 = vmatmul.mubr.f32.gmra.mxu1 %v3755_v27  ;;  %2189 = vmatmul.mubr.msk.f32.gmra.mxu0 %vm3364_vm11, %v3741_v11  ;;  %v861_v11 = vsel %vm793_vm10, %v859_v24, %v860_v32  ;;  %v862_v27 = vrot.slane %v718_v22, 2 }
 0x1bb   : > { %1442 = vmatprep.mubr.f32.mxu1 %v3836_v6  ;;  %1587 = vmatprep.mubr.f32.mxu0 %v3859_v50 }
 0x1bc   : > { %2709 = vmatprep.subr.mxu1 %v1014_v48  ;;  %v863_v36 = vsel %vm793_vm10, %v860_v32, %v862_v27 }
 0x1bd   : > { %2710 = vmatpush3.msra.mxu1 %v1014_v48 }
 0x1be   : > { %1443 = vmatmul.mubr.f32.gmra.mxu1 %v3822_v21  ;;  %1588 = vmatmul.mubr.f32.gmra.mxu0 %v3781_v56  ;;  %v1010_v56 = vld [vmem:[#allocation7 + $0x400] sm:$0xff] }
 0x1bf   : > { %1447 = vmatprep.mubr.f32.mxu1 %v3852_v58  ;;  %1592 = vmatprep.mubr.f32.mxu0 %v854_v33 }
 0x1c0   : > { %2711 = vmatprep.subr.mxu1 %v1013_v29 }
 0x1c1   : > { %2712 = vmatpush3.msra.mxu1 %v1013_v29 }
 0x1c2   : > { %1448 = vmatmul.mubr.f32.gmra.mxu1 %v3833_v54  ;;  %2191 = vmatmul.mubr.msk.f32.gmra.mxu0 %vm3364_vm11, %v3827_v51 }
 0x1c3   : > { %1452 = vmatprep.mubr.f32.mxu1 %v3864_v34  ;;  %1597 = vmatprep.mubr.f32.mxu0 %v856_v10 }
 0x1c4   : > { %2713 = vmatprep.subr.mxu1 %v1012_v2 }
 0x1c5   : > { %2714 = vmatpush3.msra.mxu1 %v1012_v2 }
 0x1c6   : > { %1453 = vmatmul.mubr.f32.gmra.mxu1 %v3859_v50  ;;  %1598 = vmatmul.mubr.f32.gmra.mxu0 %v3849_v47 }
 0x1c7   : > { %1457 = vmatprep.mubr.f32.mxu1 %v861_v11  ;;  %2715 = vmatprep.subr.mxu1 %v1011_v63 }
 0x1c8   : > { %2716 = vmatpush3.msra.mxu1 %v1011_v63  ;;  %1602 = vmatprep.mubr.f32.mxu0 %v3786_v38  ;;  %v1778_v38 = vld [vmem:[#allocation9 + $0x20] sm:$0xff] }
 0x1c9   : > { %2717 = vmatprep.subr.mxu1 %v1010_v56 }
 0x1ca   : > { %1458 = vmatmul.mubr.f32.gmra.mxu1 %v854_v33  ;;  %2193 = vmatmul.mubr.msk.f32.gmra.mxu0 %vm3364_vm11, %v3739_v9  ;;  %v1781_v9 = vld [vmem:[#allocation9 + $0x38] sm:$0xff] }
 0x1cb   : > { %1462 = vmatprep.mubr.f32.mxu1 %v863_v36  ;;  %2718 = vmatpush3.msra.mxu1 %v1010_v56 }
 0x1cc   : > { %1607 = vmatprep.mubr.f32.mxu0 %v3789_v57  ;;  %2799 = vmatprep.subr.mxu1 %v1789_v7 }
 0x1ce   : > { %1463 = vmatmul.mubr.f32.gmra.mxu1 %v856_v10  ;;  %1608 = vmatmul.mubr.f32.gmra.mxu0 %v3760_v25  ;;  %v1779_v25 = vld [vmem:[#allocation9 + $0x28] sm:$0xff] }
 0x1cf   : > { %2719 = vmatprep.mubr.f32.mxu1 %v3503_v37  ;;  %v1788_v37 = vld [vmem:[#allocation9 + $0x70] sm:$0xff] }
 0x1d0   : > { %2745 = vmatprep.subr.mxu0 %v1788_v37 }
 0x1d1   : > { %2746 = vmatpush3.msra.mxu0 %v1788_v37 }
 0x1d2   : > { %2720 = vmatmul.mubr.f32.vlgmr.msra.gmra.mxu1 %v3525_v52  ;;  %v1787_v52 = vld [vmem:[#allocation9 + $0x68] sm:$0xff] }
 0x1d3   : > { %2722 = vmatprep.mubr.f32.mxu1 %v3574_v17  ;;  %2815 = vmatpush3.msra.mxu1 %v1789_v7  ;;  %v1786_v17 = vld [vmem:[#allocation9 + $0x60] sm:$0xff] }
 0x1d4   : > { %2800 = vmatprep.subr.mxu1 %v1788_v37  ;;  %2747 = vmatprep.subr.mxu0 %v1787_v52 }
 0x1d5   : > { %2816 = vmatpush3.msra.mxu1 %v1788_v37  ;;  %2748 = vmatpush3.msra.mxu0 %v1787_v52 }
 0x1d6   : > { %2723 = vmatmul.mubr.f32.gmra.mxu1 %v3607_v23  ;;  %2801 = vmatprep.subr.mxu1 %v1787_v52  ;;  %v1785_v23 = vld [vmem:[#allocation9 + $0x58] sm:$0xff] }
 0x1d7   : > { %2725 = vmatprep.mubr.f32.mxu1 %v3655_v3  ;;  %2817 = vmatpush3.msra.mxu1 %v1787_v52  ;;  %v1784_v3 = vld [vmem:[#allocation9 + $0x50] sm:$0xff] }
 0x1d8   : > { %2749 = vmatprep.subr.mxu0 %v1786_v17  ;;  %2802 = vmatprep.subr.mxu1 %v1786_v17 }
 0x1d9   : > { %2750 = vmatpush3.msra.mxu0 %v1786_v17  ;;  %2818 = vmatpush3.msra.mxu1 %v1786_v17 }
 0x1da   : > { %2726 = vmatmul.mubr.f32.gmra.mxu1 %v3690_v20  ;;  %2751 = vmatprep.subr.mxu0 %v1785_v23  ;;  %v1783_v20 = vld [vmem:[#allocation9 + $0x48] sm:$0xff] }
 0x1db   : > { %2728 = vmatprep.mubr.f32.mxu1 %v3728_v59  ;;  %2803 = vmatprep.subr.mxu1 %v1785_v23  ;;  %v1782_v59 = vld [vmem:[#allocation9 + $0x40] sm:$0xff] }
 0x1dc   : > { %2752 = vmatpush3.msra.mxu0 %v1785_v23  ;;  %2819 = vmatpush3.msra.mxu1 %v1785_v23 }
 0x1dd   : > { %2753 = vmatprep.subr.mxu0 %v1784_v3  ;;  %2804 = vmatprep.subr.mxu1 %v1784_v3 }
 0x1de   : > { %2729 = vmatmul.mubr.f32.gmra.mxu1 %v3744_v16  ;;  %2754 = vmatpush3.msra.mxu0 %v1784_v3  ;;  %v1780_v16 = vld [vmem:[#allocation9 + $0x30] sm:$0xff] }
 0x1df   : > { %2731 = vmatprep.mubr.f32.mxu1 %v3812_v40  ;;  %2820 = vmatpush3.msra.mxu1 %v1784_v3  ;;  %v3970_v40 = vld [vmem:[%s4260_s4] ss:$0 sm:$0xff] }
 0x1e0   : > { %2755 = vmatprep.subr.mxu0 %v1783_v20  ;;  %2805 = vmatprep.subr.mxu1 %v1783_v20  ;;  %4303 = vst [vmem:[#allocation23_spill] sm:$0xff] %v3970_v40 }
 0x1e1   : > { %2756 = vmatpush3.msra.mxu0 %v1783_v20  ;;  %2821 = vmatpush3.msra.mxu1 %v1783_v20 }
 0x1e2   : > { %2732 = vmatmul.mubr.f32.gmra.mxu1 %v3836_v6  ;;  %2757 = vmatprep.subr.mxu0 %v1782_v59 }
 0x1e3   : > { %2734 = vmatprep.mubr.f32.mxu1 %v3852_v58  ;;  %2806 = vmatprep.subr.mxu1 %v1782_v59 }
 0x1e4   : > { %2758 = vmatpush3.msra.mxu0 %v1782_v59  ;;  %2822 = vmatpush3.msra.mxu1 %v1782_v59 }
 0x1e5   : > { %2759 = vmatprep.subr.mxu0 %v1781_v9  ;;  %2807 = vmatprep.subr.mxu1 %v1781_v9 }
 0x1e6   : > { %2735 = vmatmul.mubr.f32.gmra.mxu1 %v3864_v34  ;;  %2760 = vmatpush3.msra.mxu0 %v1781_v9 }
 0x1e7   : > { %2737 = vmatprep.mubr.f32.mxu1 %v861_v11  ;;  %2823 = vmatpush3.msra.mxu1 %v1781_v9 }
 0x1e8   : > { %2761 = vmatprep.subr.mxu0 %v1780_v16  ;;  %2808 = vmatprep.subr.mxu1 %v1780_v16 }
 0x1e9   : > { %2762 = vmatpush3.msra.mxu0 %v1780_v16  ;;  %2824 = vmatpush3.msra.mxu1 %v1780_v16 }
 0x1ea   : > { %2738 = vmatmul.mubr.f32.gmra.mxu1 %v863_v36  ;;  %2763 = vmatprep.subr.mxu0 %v1779_v25 }
 0x1eb   : > { %2740 = vmatprep.mubr.f32.mxu1 %v3795_v62  ;;  %2809 = vmatprep.subr.mxu1 %v1779_v25 }
 0x1ec   : > { %2764 = vmatpush3.msra.mxu0 %v1779_v25  ;;  %2825 = vmatpush3.msra.mxu1 %v1779_v25 }
 0x1ed   : > { %2765 = vmatprep.subr.mxu0 %v1778_v38  ;;  %2810 = vmatprep.subr.mxu1 %v1778_v38 }
 0x1ee   : > { %2741 = vmatmul.mubr.f32.gmra.mxu1 %v3798_v39  ;;  %2766 = vmatpush3.msra.mxu0 %v1778_v38  ;;  %v1777_v39 = vld [vmem:[#allocation9 + $0x18] sm:$0xff] }
 0x1ef   : > { %2826 = vmatpush3.msra.mxu1 %v1778_v38  ;;  %2767 = vmatprep.subr.mxu0 %v1777_v39 }
 0x1f0   : > { %2811 = vmatprep.subr.mxu1 %v1777_v39  ;;  %2768 = vmatpush3.msra.mxu0 %v1777_v39 }
 0x1f1   : > { %2827 = vmatpush3.msra.mxu1 %v1777_v39  ;;  %2769 = vmatprep.subr.mxu0 %v1776_v31 }
 0x1f2   : > { %2812 = vmatprep.subr.mxu1 %v1776_v31  ;;  %2770 = vmatpush3.msra.mxu0 %v1776_v31 }
 0x1f3   : > { %2828 = vmatpush3.msra.mxu1 %v1776_v31  ;;  %2771 = vmatprep.subr.mxu0 %v1775_v15 }
 0x1f4   : > { %2813 = vmatprep.subr.mxu1 %v1775_v15  ;;  %2772 = vmatpush3.msra.mxu0 %v1775_v15 }
 0x1f5   : > { %2829 = vmatpush3.msra.mxu1 %v1775_v15  ;;  %2773 = vmatprep.subr.mxu0 %v1774_v26 }
 0x1f6   : > { %2814 = vmatprep.subr.mxu1 %v1774_v26  ;;  %2774 = vmatpush3.msra.mxu0 %v1774_v26 }
 0x1f7   : > { %2830 = vmatpush3.msra.mxu1 %v1774_v26 }
 0x211   : > { %v2353_v62 = vpop.f32.mrf.mxu0 }
 0x212   : > { %v2273_v57 = vpop.f32.mrf.mxu1 }
 0x213   : > { %v2354_v51 = vpop.f32.mrf.mxu0 }
 0x214   : > { %v2274_v21 = vpop.f32.mrf.mxu1  ;;  %v2355_v6 = vadd.f32 %v2354_v51, %v2353_v62 }
 0x215   : > { %v2275_v54 = vadd.f32 %v2274_v21, %v2273_v57  ;;  %v2356_v5 = vpop.f32.mrf.mxu0 }
 0x216   : > { %v2276_v61 = vpop.f32.mrf.mxu1 }
 0x217   : > { %v1100_v18 = vadd.f32 %v2275_v54, %v3970_v40  ;;  %v2357_v58 = vpop.f32.mrf.mxu0 }
 0x218   : > { %v2277_v47 = vpop.f32.mrf.mxu1  ;;  %v2358_v50 = vadd.f32 %v2357_v58, %v2356_v5 }
 0x219   : > { %v3973_v41 = vadd.f32 %v2355_v6, %v1100_v18  ;;  %v2278_v43 = vadd.f32 %v2277_v47, %v2276_v61 }
 0x21a   : > { %v2279_v44 = vpop.f32.mrf.mxu1  ;;  %v2359_v13 = vpop.f32.mrf.mxu0 }
 0x21b   : > { %v1105_v34 = vadd.f32 %v2278_v43, %v3970_v40 }
 0x21c   : > { %v2280_v30 = vpop.f32.mrf.mxu1  ;;  %v2360_v55 = vpop.f32.mrf.mxu0 }
 0x21d   : > { %v3976_v28 = vadd.f32 %v2358_v50, %v1105_v34  ;;  %v2281_v0 = vadd.f32 %v2280_v30, %v2279_v44  ;;  %v2361_v1 = vadd.f32 %v2360_v55, %v2359_v13 }
 0x21e   : > { %v2282_v45 = vpop.f32.mrf.mxu1  ;;  %v2362_v35 = vpop.f32.mrf.mxu0 }
 0x21f   : > { %v1110_v49 = vadd.f32 %v2281_v0, %v3970_v40 }
 0x220   : > { %v2283_v4 = vpop.f32.mrf.mxu1  ;;  %v2363_v12 = vpop.f32.mrf.mxu0 }
 0x221   : > { %v3979_v8 = vadd.f32 %v2361_v1, %v1110_v49  ;;  %v2284_v14 = vadd.f32 %v2283_v4, %v2282_v45  ;;  %v2364_v19 = vadd.f32 %v2363_v12, %v2362_v35 }
 0x222   : > { %v2285_v42 = vpop.f32.mrf.mxu1  ;;  %v2365_v48 = vpop.f32.mrf.mxu0 }
 0x223   : > { %v1115_v53 = vadd.f32 %v2284_v14, %v3970_v40 }
 0x224   : > { %v2286_v60 = vpop.f32.mrf.mxu1  ;;  %v2366_v22 = vpop.f32.mrf.mxu0 }
 0x225   : > { %v3982_v29 = vadd.f32 %v2364_v19, %v1115_v53  ;;  %v2287_v33 = vadd.f32 %v2286_v60, %v2285_v42  ;;  %v2367_v46 = vadd.f32 %v2366_v22, %v2365_v48 }
 0x226   : > { %v2288_v2 = vpop.f32.mrf.mxu1  ;;  %v2368_v10 = vpop.f32.mrf.mxu0 }
 0x227   : > { %v1120_v24 = vadd.f32 %v2287_v33, %v3970_v40 }
 0x228   : > { %v2289_v32 = vpop.f32.mrf.mxu1  ;;  %v2369_v63 = vpop.f32.mrf.mxu0 }
 0x229   : > { %v3985_v11 = vadd.f32 %v2367_v46, %v1120_v24  ;;  %v2290_v27 = vadd.f32 %v2289_v32, %v2288_v2  ;;  %v2370_v56 = vadd.f32 %v2369_v63, %v2368_v10 }
 0x22a   : > { %v2291_v36 = vpop.f32.mrf.mxu1  ;;  %v2371_v7 = vpop.f32.mrf.mxu0 }
 0x22b   : > { %v1125_v37 = vadd.f32 %v2290_v27, %v3970_v40 }
 0x22c   : > { %v2292_v52 = vpop.f32.mrf.mxu1  ;;  %v2372_v17 = vpop.f32.mrf.mxu0 }
 0x22d   : > { %v3988_v23 = vadd.f32 %v2370_v56, %v1125_v37  ;;  %v2293_v3 = vadd.f32 %v2292_v52, %v2291_v36  ;;  %v2373_v20 = vadd.f32 %v2372_v17, %v2371_v7 }
 0x22e   : > { %v2294_v59 = vpop.f32.mrf.mxu1  ;;  %v2374_v9 = vpop.f32.mrf.mxu0 }
 0x22f   : > { %v1130_v16 = vadd.f32 %v2293_v3, %v3970_v40 }
 0x230   : > { %v2295_v25 = vpop.f32.mrf.mxu1  ;;  %v2375_v38 = vpop.f32.mrf.mxu0 }
 0x231   : > { %v3991_v57 = vadd.f32 %v2373_v20, %v1130_v16  ;;  %v2296_v62 = vadd.f32 %v2295_v25, %v2294_v59  ;;  %v2376_v39 = vadd.f32 %v2375_v38, %v2374_v9 }
 0x232   : > { %v2297_v21 = vpop.f32.mrf.mxu1  ;;  %v2377_v51 = vpop.f32.mrf.mxu0 }
 0x233   : > { %v1135_v31 = vadd.f32 %v2296_v62, %v3970_v40 }
 0x234   : > { %v2298_v54 = vpop.f32.mrf.mxu1  ;;  %v2378_v6 = vpop.f32.mrf.mxu0 }
 0x235   : > { %v3994_v61 = vadd.f32 %v2376_v39, %v1135_v31  ;;  %v2299_v5 = vadd.f32 %v2298_v54, %v2297_v21  ;;  %v2379_v15 = vadd.f32 %v2378_v6, %v2377_v51 }
 0x236   : > { %v2300_v18 = vpop.f32.mrf.mxu1  ;;  %v2380_v47 = vpop.f32.mrf.mxu0 }
 0x237   : > { %v1140_v58 = vadd.f32 %v2299_v5, %v3970_v40 }
 0x238   : > { %v2301_v26 = vpop.f32.mrf.mxu1  ;;  %v2381_v43 = vpop.f32.mrf.mxu0 }
 0x239   : > { %v3997_v50 = vadd.f32 %v2379_v15, %v1140_v58  ;;  %v2302_v44 = vadd.f32 %v2301_v26, %v2300_v18  ;;  %v2382_v13 = vadd.f32 %v2381_v43, %v2380_v47 }
 0x23a   : > { %v2303_v34 = vpop.f32.mrf.mxu1  ;;  %v2383_v30 = vpop.f32.mrf.mxu0 }
 0x23b   : > { %v1145_v55 = vadd.f32 %v2302_v44, %v3970_v40 }
 0x23c   : > { %v2304_v0 = vpop.f32.mrf.mxu1  ;;  %v2384_v1 = vpop.f32.mrf.mxu0 }
 0x23d   : > { %v4000_v45 = vadd.f32 %v2382_v13, %v1145_v55  ;;  %v2305_v35 = vadd.f32 %v2304_v0, %v2303_v34  ;;  %v2385_v49 = vadd.f32 %v2384_v1, %v2383_v30 }
 0x23e   : > { %v2306_v4 = vpop.f32.mrf.mxu1  ;;  %v2386_v12 = vpop.f32.mrf.mxu0 }
 0x23f   : > { %v1150_v14 = vadd.f32 %v2305_v35, %v3970_v40 }
 0x240   : > { %v2307_v19 = vpop.f32.mrf.mxu1  ;;  %v2387_v42 = vpop.f32.mrf.mxu0 }
 0x241   : > { %v4003_v48 = vadd.f32 %v2385_v49, %v1150_v14  ;;  %v2308_v53 = vadd.f32 %v2307_v19, %v2306_v4  ;;  %v2388_v60 = vadd.f32 %v2387_v42, %v2386_v12 }
 0x242   : > { %v2309_v22 = vpop.f32.mrf.mxu1  ;;  %v2389_v33 = vpop.f32.mrf.mxu0 }
 0x243   : > { %4304 = vst [vmem:[#allocation24_spill] sm:$0xff] %v4003_v48  ;;  %v1155_v46 = vadd.f32 %v2308_v53, %v3970_v40 }
 0x244   : > { %v2310_v2 = vpop.f32.mrf.mxu1  ;;  %v2390_v10 = vpop.f32.mrf.mxu0 }
 0x245   : > { %v4006_v24 = vadd.f32 %v2388_v60, %v1155_v46  ;;  %v2311_v32 = vadd.f32 %v2310_v2, %v2309_v22  ;;  %v2391_v63 = vadd.f32 %v2390_v10, %v2389_v33 }
 0x246   : > { %v2312_v27 = vpop.f32.mrf.mxu1  ;;  %v2392_v56 = vpop.f32.mrf.mxu0 }
 0x247   : > { %4305 = vst [vmem:[#allocation25_spill] sm:$0xff] %v4006_v24  ;;  %v1160_v36 = vadd.f32 %v2311_v32, %v3970_v40 }
 0x248   : > { %v2313_v7 = vpop.f32.mrf.mxu1  ;;  %v2393_v37 = vpop.f32.mrf.mxu0 }
 0x249   : > { %v4009_v52 = vadd.f32 %v2391_v63, %v1160_v36  ;;  %v2314_v17 = vadd.f32 %v2313_v7, %v2312_v27  ;;  %v2394_v3 = vadd.f32 %v2393_v37, %v2392_v56 }
 0x24a   : > { %v2315_v20 = vpop.f32.mrf.mxu1  ;;  %v2395_v59 = vpop.f32.mrf.mxu0 }
 0x24b   : > { %4306 = vst [vmem:[#allocation26_spill] sm:$0xff] %v4009_v52  ;;  %v1165_v9 = vadd.f32 %v2314_v17, %v3970_v40 }
 0x24c   : > { %v2316_v16 = vpop.f32.mrf.mxu1  ;;  %v2396_v25 = vpop.f32.mrf.mxu0 }
 0x24d   : > { %v4012_v38 = vadd.f32 %v2394_v3, %v1165_v9  ;;  %v2317_v62 = vadd.f32 %v2316_v16, %v2315_v20  ;;  %v2397_v31 = vadd.f32 %v2396_v25, %v2395_v59 }
 0x24e   : > { %v2318_v39 = vpop.f32.mrf.mxu1  ;;  %v4014_v21 = vpop.f32.mrf.mxu0 }
 0x24f   : > { %4307 = vst [vmem:[#allocation27_spill] sm:$0xff] %v4012_v38  ;;  %4308 = vst [vmem:[#allocation28_spill] sm:$0xff] %v4014_v21  ;;  %v1170_v51 = vadd.f32 %v2317_v62, %v3970_v40 }
 0x250   : > { %v2319_v54 = vpop.f32.mrf.mxu1  ;;  %v4017_v6 = vpop.f32.mrf.mxu0 }
 0x251   : > { %4309 = vst [vmem:[#allocation29_spill] sm:$0xff] %v4017_v6  ;;  %v4019_v5 = vadd.f32 %v2397_v31, %v1170_v51  ;;  %v4021_v15 = vadd.f32 %v2319_v54, %v2318_v39 }
 0x252   : > { %v2433_v18 = vpop.f32.mrf.mxu1  ;;  %v4023_v47 = vpop.f32.mrf.mxu0 }
 0x253   : > { %4310 = vst [vmem:[#allocation30_spill] sm:$0xff] %v4019_v5  ;;  %4311 = vst [vmem:[#allocation31_spill] sm:$0xff] %v4021_v15 }
 0x254   : > { %v2434_v58 = vpop.f32.mrf.mxu1  ;;  %v2514_v26 = vpop.f32.mrf.mxu0 }
 0x255   : > { %v2435_v24 = vadd.f32 %v2434_v58, %v2433_v18 }
 0x256   : > { %v2436_v43 = vpop.f32.mrf.mxu1  ;;  %v2516_v44 = vpop.f32.mrf.mxu0 }
 0x258   : > { %v2437_v13 = vpop.f32.mrf.mxu1  ;;  %v2517_v34 = vpop.f32.mrf.mxu0 }
 0x259   : > { %v2438_v48 = vadd.f32 %v2437_v13, %v2436_v43  ;;  %v2515_v43 = vadd.f32 %v2514_v26, %v4023_v47 }
 0x25a   : > { %v2439_v30 = vpop.f32.mrf.mxu1  ;;  %v4025_v55 = vpop.f32.mrf.mxu0 }
 0x25c   : > { %v2440_v0 = vpop.f32.mrf.mxu1  ;;  %v4027_v1 = vpop.f32.mrf.mxu0 }
 0x25e   : > { %v2442_v35 = vpop.f32.mrf.mxu1  ;;  %v2522_v49 = vpop.f32.mrf.mxu0 }
 0x260   : > { %v2443_v4 = vpop.f32.mrf.mxu1  ;;  %v2523_v12 = vpop.f32.mrf.mxu0 }
 0x262   : > { %v2445_v14 = vpop.f32.mrf.mxu1  ;;  %v4029_v19 = vpop.f32.mrf.mxu0 }
 0x264   : > { %v2446_v42 = vpop.f32.mrf.mxu1  ;;  %v4031_v53 = vpop.f32.mrf.mxu0 }
 0x266   : > { %v2448_v60 = vpop.f32.mrf.mxu1  ;;  %v4033_v22 = vpop.f32.mrf.mxu0 }
 0x268   : > { %v2449_v33 = vpop.f32.mrf.mxu1  ;;  %v4035_v46 = vpop.f32.mrf.mxu0 }
 0x269   : > { %v2450_v58 = vadd.f32 %v2449_v33, %v2448_v60 }
 0x26a   : > { %v2451_v2 = vpop.f32.mrf.mxu1  ;;  %v4037_v10 = vpop.f32.mrf.mxu0 }
 0x26b   : > { %v1415_v26 = vadd.f32 %v2450_v58, %v3988_v23 }
 0x26c   : > { %v2452_v32 = vpop.f32.mrf.mxu1  ;;  %v4039_v63 = vpop.f32.mrf.mxu0 }
 0x26e   : > { %v2454_v27 = vpop.f32.mrf.mxu1  ;;  %v4041_v56 = vpop.f32.mrf.mxu0 }
 0x270   : > { %v2455_v36 = vpop.f32.mrf.mxu1  ;;  %v4043_v7 = vpop.f32.mrf.mxu0 }
 0x272   : > { %v4045_v37 = vpop.f32.mrf.mxu1  ;;  %v4047_v17 = vpop.f32.mrf.mxu0 }
 0x273   : > { %4312 = vst [vmem:[#allocation32_spill] sm:$0xff] %v4047_v17 }
 0x274   : > { %v4049_v3 = vpop.f32.mrf.mxu1  ;;  %v4051_v20 = vpop.f32.mrf.mxu0 }
 0x275   : > { %4313 = vst [vmem:[#allocation33_spill] sm:$0xff] %v4051_v20 }
 0x276   : > { %v2460_v59 = vpop.f32.mrf.mxu1  ;;  %v4053_v9 = vpop.f32.mrf.mxu0 }
 0x278   : > { %v2461_v16 = vpop.f32.mrf.mxu1  ;;  %v4055_v25 = vpop.f32.mrf.mxu0 }
 0x279   : > { %4314 = vst [vmem:[#allocation34_spill] sm:$0xff] %v4055_v25  ;;  %v2518_v25 = vadd.f32 %v2517_v34, %v2516_v44  ;;  %v2456_v34 = vadd.f32 %v2455_v36, %v2454_v27 }
 0x27a   : > { %v4057_v62 = vpop.f32.mrf.mxu1  ;;  %v4061_v51 = vpop.f32.mrf.mxu0 }
 0x27b   : > { %4315 = vst [vmem:[#allocation35_spill] sm:$0xff] %v4061_v51 }
 0x27c   : > { %v4059_v39 = vpop.f32.mrf.mxu1  ;;  %v4067_v5 = vpop.f32.mrf.mxu0  ;;  %v4327_v58 = vld [vmem:[#allocation33_spill] sm:$0xff] }
 0x27d   : > { %4316 = vst [vmem:[#allocation36_spill] sm:$0xff] %v4067_v5  ;;  %v1395_v5 = vadd.f32 %v2438_v48, %v3976_v28  ;;  %v2447_v48 = vadd.f32 %v2446_v42, %v2445_v14  ;;  %v1425_v14 = vadd.f32 %v2456_v34, %v3994_v61  ;;  %v2462_v42 = vadd.f32 %v2461_v16, %v2460_v59 }
 0x27e   : > { %v4063_v31 = vpop.f32.mrf.mxu1  ;;  %v4073_v6 = vpop.f32.mrf.mxu0  ;;  %v2533_v61 = vadd.f32 %v4039_v63, %v4037_v10 }
 0x27f   : > { %4319 = vst [vmem:[#allocation39_spill] sm:$0xff] %v4073_v6  ;;  %v1390_v6 = vadd.f32 %v2435_v24, %v3973_v41  ;;  %v2521_v24 = vadd.f32 %v4027_v1, %v4025_v55  ;;  %v2527_v55 = vadd.f32 %v4031_v53, %v4029_v19  ;;  %v2536_v19 = vadd.f32 %v4043_v7, %v4041_v56 }
 0x280   : > { %v4065_v54 = vpop.f32.mrf.mxu1  ;;  %v4079_v40 = vpop.f32.mrf.mxu0  ;;  %v2465_v56 = vadd.f32 %v4059_v39, %v4057_v62  ;;  %v4325_v10 = vld [vmem:[#allocation34_spill] sm:$0xff] }
 0x281   : > { %v2542_v63 = vadd.f32 %v4325_v10, %v4053_v9 }
 0x282   : > { %v4069_v52 = vpop.f32.mrf.mxu1  ;;  %v4085_v17 = vpop.f32.mrf.mxu0 }
 0x283   : > { %4317 = vst [vmem:[#allocation37_spill] sm:$0xff] %v4069_v52  ;;  %4324 = vst [vmem:[#allocation44_spill] sm:$0xff] %v4085_v17  ;;  %v2444_v52 = vadd.f32 %v2443_v4, %v2442_v35  ;;  %v1535_v35 = vadd.f32 %v2515_v43, %v1390_v6  ;;  %v2524_v4 = vadd.f32 %v2523_v12, %v2522_v49 }
 0x284   : > { %v4071_v38 = vpop.f32.mrf.mxu1  ;;  %v4094_v13 = vpop.f32.mrf.mxu0  ;;  %v2530_v6 = vadd.f32 %v4035_v46, %v4033_v22  ;;  %v2459_v22 = vadd.f32 %v4049_v3, %v4045_v37  ;;  %v2468_v37 = vadd.f32 %v4065_v54, %v4063_v31  ;;  %v1570_v3 = vadd.f32 %v2536_v19, %v1425_v14 }
 0x285   : > { %4318 = vst [vmem:[#allocation38_spill] sm:$0xff] %v4071_v38  ;;  %v1405_v18 = vadd.f32 %v2444_v52, %v3982_v29 }
 0x286   : > { %v4075_v21 = vpop.f32.mrf.mxu1  ;;  %v4100_v44 = vpop.f32.mrf.mxu0  ;;  %v1430_v59 = vadd.f32 %v2459_v22, %v3997_v50  ;;  %v4341_v22 = vld [vmem:[#allocation27_spill] sm:$0xff] }
 0x287   : > { %4320 = vst [vmem:[#allocation40_spill] sm:$0xff] %v4075_v21  ;;  %v2441_v21 = vadd.f32 %v2440_v0, %v2439_v30  ;;  %v1550_v29 = vadd.f32 %v2524_v4, %v1405_v18  ;;  %v2453_v30 = vadd.f32 %v2452_v32, %v2451_v2  ;;  %v4326_v18 = vld [vmem:[#allocation32_spill] sm:$0xff] }
 0x288   : > { %v4077_v15 = vpop.f32.mrf.mxu1  ;;  %v4108_v1 = vpop.f32.mrf.mxu0  ;;  %v2539_v31 = vadd.f32 %v4327_v58, %v4326_v18  ;;  %v4346_v18 = vld [vmem:[#allocation30_spill] sm:$0xff] }
 0x289   : > { %4321 = vst [vmem:[#allocation41_spill] sm:$0xff] %v4077_v15  ;;  %v1400_v28 = vadd.f32 %v2441_v21, %v3979_v8  ;;  %v1420_v33 = vadd.f32 %v2453_v30, %v3991_v57  ;;  %v1435_v57 = vadd.f32 %v2462_v42, %v4000_v45  ;;  %v4335_v30 = vld [vmem:[#allocation31_spill] sm:$0xff] }
 0x28a   : > { %v4081_v51 = vpop.f32.mrf.mxu1  ;;  %v4114_v46 = vpop.f32.mrf.mxu0  ;;  %v4345_v10 = vld [vmem:[#allocation44_spill] sm:$0xff] }
 0x28b   : > { %4322 = vst [vmem:[#allocation42_spill] sm:$0xff] %v4081_v51  ;;  %v1545_v21 = vadd.f32 %v2521_v24, %v1400_v28  ;;  %v4328_v28 = vld [vmem:[#allocation25_spill] sm:$0xff]  ;;  %v1580_v62 = vadd.f32 %v2542_v63, %v1435_v57 }
 0x28c   : > { %v4083_v20 = vpop.f32.mrf.mxu1  ;;  %v2556_v7 = vpop.f32.mrf.mxu0  ;;  %v4333_v9 = vld [vmem:[#allocation38_spill] sm:$0xff] }
 0x28d   : > { %4323 = vst [vmem:[#allocation43_spill] sm:$0xff] %v4083_v20  ;;  %v1540_v20 = vadd.f32 %v2518_v25, %v1395_v5  ;;  %v1410_v5 = vadd.f32 %v2447_v48, %v3985_v11  ;;  %v1560_v11 = vadd.f32 %v2530_v6, %v1415_v26  ;;  %v1565_v25 = vadd.f32 %v2533_v61, %v1420_v33 }
 0x28e   : > { %v4088_v38 = vpop.f32.mrf.mxu1  ;;  %v1445_v48 = vadd.f32 %v2468_v37, %v4328_v28  ;;  %v4329_v50 = vld [vmem:[#allocation40_spill] sm:$0xff]  ;;  %v2558_v34 = vpop.f32.mrf.mxu0 }
 0x28f   : > { %v1555_v32 = vadd.f32 %v2527_v55, %v1410_v5  ;;  %v4334_v5 = vld [vmem:[#allocation23_spill] sm:$0xff] }
 0x290   : > { %v4091_v15 = vpop.f32.mrf.mxu1  ;;  %v4337_v55 = vld [vmem:[#allocation35_spill] sm:$0xff]  ;;  %v2559_v57 = vpop.f32.mrf.mxu0 }
 0x292   : > { %v2721_v17 = vpop.f32.mrf.mxu1 }
 0x293   : > { %v1685_v51 = vadd.f32 %v2721_v17, %v1540_v20 }
 0x294   : > { %v1679_v41 = vpop.f32.mrf.mxu1  ;;  %v4344_v61 = vld [vmem:[#allocation43_spill] sm:$0xff] }
 0x295   : > { %v1680_v47 = vadd.f32 %v1679_v41, %v1535_v35  ;;  %v1759_v0 = vmax.f32 %v1685_v51, 0.0  ;;  %v4330_v35 = vld [vmem:[#allocation41_spill] sm:$0xff]  ;;  %v4331_v41 = vld [vmem:[#allocation24_spill] sm:$0xff] }
 0x296   : > { %v2724_v52 = vpop.f32.mrf.mxu1  ;;  %v2474_v4 = vadd.f32 %v4330_v35, %v4329_v50  ;;  %v1440_v24 = vadd.f32 %v2465_v56, %v4331_v41 }
 0x297   : > { %v1758_v8 = vmax.f32 %v1680_v47, 0.0  ;;  %v1695_v49 = vadd.f32 %v2724_v52, %v1550_v29  ;;  %v4332_v47 = vld [vmem:[#allocation37_spill] sm:$0xff]  ;;  %v1575_v52 = vadd.f32 %v2539_v31, %v1430_v59  ;;  %v2554_v59 = vadd.f32 %v4108_v1, %v4100_v44 }
 0x298   : > { %v1689_v12 = vpop.f32.mrf.mxu1  ;;  %v2471_v26 = vadd.f32 %v4333_v9, %v4332_v47  ;;  %v2557_v31 = vadd.f32 %v2556_v7, %v4114_v46  ;;  %v4159_v7 = vld [vmem:[%s4262_s6] ss:$0 sm:$0xff] }
 0x299   : > { %v1690_v23 = vadd.f32 %v1689_v12, %v1545_v21  ;;  %2775 = vmatprep.mubr.f32.mxu0 %v1758_v8  ;;  %v1761_v53 = vmax.f32 %v1695_v49, 0.0  ;;  %v1175_v8 = vadd.f32 %v4335_v30, %v4334_v5  ;;  %v4336_v21 = vld [vmem:[#allocation39_spill] sm:$0xff]  ;;  %v1943_v5 = vld [vmem:[#allocation2 + $0x10] sm:$0xff] }
 0x29a   : > { %v2727_v60 = vpop.f32.mrf.mxu1  ;;  %2776 = vmatmul.mubr.f32.vlgmr.msra.gmra.mxu0 %v1759_v0  ;;  %v2548_v6 = vadd.f32 %v4079_v40, %v4336_v21  ;;  %v4342_v40 = vld [vmem:[#allocation26_spill] sm:$0xff] }
 0x29b   : > { %v1760_v2 = vmax.f32 %v1690_v23, 0.0  ;;  %v1705_v27 = vadd.f32 %v2727_v60, %v1560_v11  ;;  %v4338_v23 = vld [vmem:[#allocation36_spill] sm:$0xff]  ;;  %v4340_v60 = vld [vmem:[#allocation29_spill] sm:$0xff] }
 0x29c   : > { %v1699_v36 = vpop.f32.mrf.mxu1  ;;  %v2545_v14 = vadd.f32 %v4338_v23, %v4337_v55  ;;  %v4339_v11 = vld [vmem:[#allocation28_spill] sm:$0xff]  ;;  %v1590_v19 = vadd.f32 %v2548_v6, %v1445_v48  ;;  %v1945_v23 = vld [vmem:[#allocation2 + $0x20] sm:$0xff] }
 0x29d   : > { %v1700_v17 = vadd.f32 %v1699_v36, %v1555_v32  ;;  %2778 = vmatprep.mubr.f32.mxu0 %v1760_v2  ;;  %v1763_v51 = vmax.f32 %v1705_v27, 0.0  ;;  %v2400_v33 = vadd.f32 %v4340_v60, %v4339_v11  ;;  %v1455_v2 = vadd.f32 %v2474_v4, %v4341_v22  ;;  %v4343_v36 = vld [vmem:[#allocation42_spill] sm:$0xff]  ;;  %v1946_v6 = vld [vmem:[#allocation2 + $0x28] sm:$0xff] }
 0x29e   : > { %v2730_v20 = vpop.f32.mrf.mxu1  ;;  %2779 = vmatmul.mubr.f32.gmra.mxu0 %v1761_v53  ;;  %v2480_v32 = vadd.f32 %v4091_v15, %v4088_v38  ;;  %v1450_v27 = vadd.f32 %v2471_v26, %v4342_v40  ;;  %v2551_v38 = vadd.f32 %v4094_v13, %v4345_v10 }
 0x29f   : > { %v1762_v16 = vmax.f32 %v1700_v17, 0.0  ;;  %v1715_v43 = vadd.f32 %v2730_v20, %v1570_v3  ;;  %v2477_v17 = vadd.f32 %v4344_v61, %v4343_v36  ;;  %v1585_v3 = vadd.f32 %v2545_v14, %v1440_v24 }
 0x2a0   : > { %v1709_v45 = vpop.f32.mrf.mxu1  ;;  %v1320_v20 = vadd.f32 %v2400_v33, %v1175_v8  ;;  %v1595_v28 = vadd.f32 %v2551_v38, %v1450_v27  ;;  %v1948_v33 = vld [vmem:[#allocation2 + $0x38] sm:$0xff] }
 0x2a1   : > { %v1710_v54 = vadd.f32 %v1709_v45, %v1565_v25  ;;  %2781 = vmatprep.mubr.f32.mxu0 %v1762_v16  ;;  %v1765_v0 = vmax.f32 %v1715_v43, 0.0  ;;  %v1600_v43 = vadd.f32 %v2554_v59, %v1455_v2  ;;  %v1460_v58 = vadd.f32 %v2477_v17, %v4346_v18  ;;  %v1950_v17 = vld [vmem:[#allocation2 + $0x48] sm:$0xff]  ;;  %v1949_v59 = vld [vmem:[#allocation2 + $0x40] sm:$0xff]  ;;  %v1952_v38 = vld [vmem:[#allocation2 + $0x58] sm:$0xff] }
 0x2a2   : > { %v2733_v39 = vpop.f32.mrf.mxu1  ;;  %2782 = vmatmul.mubr.f32.gmra.mxu0 %v1763_v51  ;;  %v1465_v63 = vadd.f32 %v2480_v32, %v1320_v20  ;;  %v2560_v51 = vadd.f32 %v2559_v57, %v2558_v34  ;;  %v1944_v34 = vld [vmem:[#allocation2 + $0x18] sm:$0xff] }
 0x2a3   : > { %v1764_v29 = vmax.f32 %v1710_v54, 0.0  ;;  %v1725_v49 = vadd.f32 %v2733_v39, %v1580_v62  ;;  %v1605_v62 = vadd.f32 %v2557_v31, %v1460_v58 }
 0x2a4   : > { %v1719_v12 = vpop.f32.mrf.mxu1  ;;  %v1610_v35 = vadd.f32 %v2560_v51, %v1465_v63 }
 0x2a5   : > { %v1720_v42 = vadd.f32 %v1719_v12, %v1575_v52  ;;  %2784 = vmatprep.mubr.f32.mxu1 %v1764_v29  ;;  %v1767_v56 = vmax.f32 %v1725_v49, 0.0 }
 0x2a6   : > { %v2736_v53 = vpop.f32.mrf.mxu1  ;;  %2785 = vmatmul.mubr.f32.vlgmr.msra.gmra.mxu1 %v1765_v0 }
 0x2a7   : > { %v1766_v37 = vmax.f32 %v1720_v42, 0.0  ;;  %v1735_v16 = vadd.f32 %v2736_v53, %v1590_v19  ;;  %v1947_v53 = vld [vmem:[#allocation2 + $0x30] sm:$0xff] }
 0x2a8   : > { %v1729_v25 = vpop.f32.mrf.mxu1 }
 0x2a9   : > { %v1730_v15 = vadd.f32 %v1729_v25, %v1585_v3  ;;  %2787 = vmatprep.mubr.f32.mxu1 %v1766_v37  ;;  %v1769_v44 = vmax.f32 %v1735_v16, 0.0 }
 0x2aa   : > { %v2739_v45 = vpop.f32.mrf.mxu1  ;;  %2788 = vmatmul.mubr.f32.gmra.mxu1 %v1767_v56 }
 0x2ab   : > { %v1768_v54 = vmax.f32 %v1730_v15, 0.0  ;;  %v1745_v1 = vadd.f32 %v2739_v45, %v1600_v43  ;;  %v1951_v45 = vld [vmem:[#allocation2 + $0x50] sm:$0xff] }
 0x2ac   : > { %v1739_v48 = vpop.f32.mrf.mxu1 }
 0x2ad   : > { %v1740_v50 = vadd.f32 %v1739_v48, %v1595_v28  ;;  %2790 = vmatprep.mubr.f32.mxu1 %v1768_v54  ;;  %v1771_v39 = vmax.f32 %v1745_v1, 0.0  ;;  %v1954_v28 = vld [vmem:[#allocation2 + $0x68] sm:$0xff] }
 0x2ae   : > { %v2742_v13 = vpop.f32.mrf.mxu1  ;;  %2791 = vmatmul.mubr.f32.gmra.mxu1 %v1769_v44 }
 0x2af   : > { %v1770_v4 = vmax.f32 %v1740_v50, 0.0  ;;  %v1755_v41 = vadd.f32 %v2742_v13, %v1610_v35  ;;  %v1953_v35 = vld [vmem:[#allocation2 + $0x60] sm:$0xff] }
 0x2b0   : > { %v1749_v24 = vpop.f32.mrf.mxu1 }
 0x2b1   : > { %v1750_v47 = vadd.f32 %v1749_v24, %v1605_v62  ;;  %2793 = vmatprep.mubr.f32.mxu1 %v1770_v4  ;;  %v1773_v46 = vmax.f32 %v1755_v41, 0.0  ;;  %v1956_v41 = vld [vmem:[#allocation2 + $0x78] sm:$0xff] }
 0x2b2   : > { %2794 = vmatmul.mubr.f32.gmra.mxu1 %v1771_v39 }
 0x2b3   : > { %v1772_v9 = vmax.f32 %v1750_v47, 0.0 }
 0x2b5   : > { %2796 = vmatprep.mubr.f32.mxu1 %v1772_v9 }
 0x2b6   : > { %2797 = vmatmul.mubr.f32.gmra.mxu1 %v1773_v46 }
 0x35a   : > { %v2777_v26 = vpop.f32.mrf.mxu0 }
 0x35b   : > { %v1869_v29 = vadd.f32 %v2777_v26, %v4159_v7  ;;  %v1955_v26 = vld [vmem:[#allocation2 + $0x70] sm:$0xff] }
 0x35c   : > { %v1863_v52 = vpop.f32.mrf.mxu0 }
 0x35d   : > { %v1960_v30 = vadd.f32 %v1944_v34, %v1869_v29  ;;  %v1864_v8 = vadd.f32 %v4159_v7, %v1863_v52 }
 0x35e   : > { %v2780_v21 = vpop.f32.mrf.mxu0 }
 0x35f   : > { %v1976_v0 = vmax.f32 %v1960_v30, 0.0  ;;  %v1959_v49 = vadd.f32 %v1943_v5, %v1864_v8  ;;  %v1879_v12 = vadd.f32 %v2780_v21, %v4159_v7  ;;  %v1958_v30 = vld [vmem:[#allocation2 + $0x88] sm:$0xff] }
 0x360   : > { %v1873_v55 = vpop.f32.mrf.mxu0 }
 0x361   : > { %1992 = vst [vmem:[%s3338_s13 + $0x8] sm:$0xff] %v1976_v0  ;;  %v1975_v14 = vmax.f32 %v1959_v49, 0.0  ;;  %v1962_v42 = vadd.f32 %v1946_v6, %v1879_v12  ;;  %v1874_v11 = vadd.f32 %v4159_v7, %v1873_v55  ;;  %v1957_v49 = vld [vmem:[#allocation2 + $0x80] sm:$0xff] }
 0x362   : > { %v2783_v60 = vpop.f32.mrf.mxu0 }
 0x363   : > { %1991 = vst [vmem:[%s3338_s13] sm:$0xff] %v1975_v14  ;;  %v1978_v22 = vmax.f32 %v1962_v42, 0.0  ;;  %v1961_v2 = vadd.f32 %v1945_v23, %v1874_v11  ;;  %v1889_v32 = vadd.f32 %v2783_v60, %v4159_v7 }
 0x364   : > { %v1883_v19 = vpop.f32.mrf.mxu0 }
 0x365   : > { %1994 = vst [vmem:[%s3338_s13 + $0x18] sm:$0xff] %v1978_v22  ;;  %v1977_v40 = vmax.f32 %v1961_v2, 0.0  ;;  %v1964_v27 = vadd.f32 %v1948_v33, %v1889_v32  ;;  %v1884_v36 = vadd.f32 %v4159_v7, %v1883_v19 }
 0x366   : > { %v2786_v61 = vpop.f32.mrf.mxu1 }
 0x367   : > { %1993 = vst [vmem:[%s3338_s13 + $0x10] sm:$0xff] %v1977_v40  ;;  %v1980_v57 = vmax.f32 %v1964_v27, 0.0  ;;  %v1963_v37 = vadd.f32 %v1947_v53, %v1884_v36  ;;  %v1899_v3 = vadd.f32 %v2786_v61, %v4159_v7 }
 0x368   : > { %v1893_v20 = vpop.f32.mrf.mxu1 }
 0x369   : > { %1996 = vst [vmem:[%s3338_s13 + $0x28] sm:$0xff] %v1980_v57  ;;  %v1979_v56 = vmax.f32 %v1963_v37, 0.0  ;;  %v1966_v16 = vadd.f32 %v1950_v17, %v1899_v3  ;;  %v1894_v25 = vadd.f32 %v4159_v7, %v1893_v20 }
 0x36a   : > { %v2789_v10 = vpop.f32.mrf.mxu1 }
 0x36b   : > { %1995 = vst [vmem:[%s3338_s13 + $0x20] sm:$0xff] %v1979_v56  ;;  %v1982_v15 = vmax.f32 %v1966_v16, 0.0  ;;  %v1965_v63 = vadd.f32 %v1949_v59, %v1894_v25  ;;  %v1909_v51 = vadd.f32 %v2789_v10, %v4159_v7 }
 0x36c   : > { %v1903_v43 = vpop.f32.mrf.mxu1 }
 0x36d   : > { %1998 = vst [vmem:[%s3338_s13 + $0x38] sm:$0xff] %v1982_v15  ;;  %v1981_v18 = vmax.f32 %v1965_v63, 0.0  ;;  %v1968_v58 = vadd.f32 %v1952_v38, %v1909_v51  ;;  %v1904_v31 = vadd.f32 %v4159_v7, %v1903_v43 }
 0x36e   : > { %v2792_v54 = vpop.f32.mrf.mxu1 }
 0x36f   : > { %1997 = vst [vmem:[%s3338_s13 + $0x30] sm:$0xff] %v1981_v18  ;;  %v1984_v44 = vmax.f32 %v1968_v58, 0.0  ;;  %v1967_v1 = vadd.f32 %v1951_v45, %v1904_v31  ;;  %v1919_v48 = vadd.f32 %v2792_v54, %v4159_v7 }
 0x370   : > { %v1913_v50 = vpop.f32.mrf.mxu1 }
 0x371   : > { %2000 = vst [vmem:[%s3338_s13 + $0x48] sm:$0xff] %v1984_v44  ;;  %v1983_v13 = vmax.f32 %v1967_v1, 0.0  ;;  %v1970_v4 = vadd.f32 %v1954_v28, %v1919_v48  ;;  %v1914_v62 = vadd.f32 %v4159_v7, %v1913_v50 }
 0x372   : > { %v2795_v39 = vpop.f32.mrf.mxu1 }
 0x373   : > { %1999 = vst [vmem:[%s3338_s13 + $0x40] sm:$0xff] %v1983_v13  ;;  %v1986_v24 = vmax.f32 %v1970_v4, 0.0  ;;  %v1969_v47 = vadd.f32 %v1953_v35, %v1914_v62  ;;  %v1929_v9 = vadd.f32 %v2795_v39, %v4159_v7 }
 0x374   : > { %v1923_v46 = vpop.f32.mrf.mxu1 }
 0x375   : > { %2002 = vst [vmem:[%s3338_s13 + $0x58] sm:$0xff] %v1986_v24  ;;  %v1985_v34 = vmax.f32 %v1969_v47, 0.0  ;;  %v1972_v29 = vadd.f32 %v1956_v41, %v1929_v9  ;;  %v1924_v52 = vadd.f32 %v4159_v7, %v1923_v46 }
 0x376   : > { %v2798_v5 = vpop.f32.mrf.mxu1 }
 0x377   : > { %2001 = vst [vmem:[%s3338_s13 + $0x50] sm:$0xff] %v1985_v34  ;;  %v1988_v8 = vmax.f32 %v1972_v29, 0.0  ;;  %v1971_v21 = vadd.f32 %v1955_v26, %v1924_v52  ;;  %v1939_v6 = vadd.f32 %v2798_v5, %v4159_v7 }
 0x378   : > { %v1933_v0 = vpop.f32.mrf.mxu1 }
 0x379   : > { %2004 = vst [vmem:[%s3338_s13 + $0x68] sm:$0xff] %v1988_v8  ;;  %v1987_v12 = vmax.f32 %v1971_v21, 0.0  ;;  %v1974_v55 = vadd.f32 %v1958_v30, %v1939_v6  ;;  %v1934_v23 = vadd.f32 %v4159_v7, %v1933_v0 }
 0x37b   : > { %2003 = vst [vmem:[%s3338_s13 + $0x60] sm:$0xff] %v1987_v12  ;;  %v1990_v14 = vmax.f32 %v1974_v55, 0.0  ;;  %v1973_v42 = vadd.f32 %v1957_v49, %v1934_v23 }
 0x37d   : > { %2006 = vst [vmem:[%s3338_s13 + $0x78] sm:$0xff] %v1990_v14  ;;  %v1989_v11 = vmax.f32 %v1973_v42, 0.0 }
 0x37f   : > { %2005 = vst [vmem:[%s3338_s13 + $0x70] sm:$0xff] %v1989_v11 }
 0x380   : > { %3051 = shalt.err (!%p3048_p0)
}
 0x381   : > { %s3052_s30 = scalar_lea.hbm %s4197_s20, 2048  ;;  %s3056_s12 = scalar_lea.hbm %s4263_s7, 8192 }
 0x382   : > { %p3053_p1 = scmp.ne.s32.totalorder %s4197_s20, %s3052_s30  ;;  %p3057_p11 = scmp.lt.s32.totalorder %s4197_s20, %s4263_s7 }
 0x383   : > { %p3058_p13 = scmp.lt.s32.totalorder %s3056_s12, %s3052_s30 }
 0x384   : > { %p3054_p7 = pnand %p3053_p1, %p3243_p3 }
 0x385   : > { %p3059_p2 = por %p3058_p13, %p3057_p11 }
 0x386   : > { %p3055_p9 = pneg %p3054_p7 }
 0x388   : > { %p3060_p5 = pnand %p3059_p2, %p3055_p9 }
 0x38a   : > { %3063 = shalt.err (!%p3060_p5)
}
 0x38b   : > { %s3149_s9 = smov 128   ;;  %s3150_s10 = smov 8  }
 0x38c   : > { %2843 = dma.vmem_to_hbm [thread:$0]  (%p3243_p3), %s4199_s28, 2048, %s4197_s20, %s4205_s23, %s3149_s9, %s3149_s9, %s3150_s10  }
 0x38d PF: > { %p2865_p4 = scmp.ge.s32.totalorder %s3140_s8, 2  ;;  %s2039_s11 = sand.u32 1, %s3112_s24  }
 0x38e   : > { %p4347_p6 = scmp.ne.s32.totalorder %s4277_s16, 0  ;;  %s2040_s27 = scalar_lea.sflag [#allocation6], %s2039_s11 }
 0x390   : > { %p2856_p8 = pnand %p2865_p4, %p4347_p6 }
 0x392   : > { %p2857_p10 = pneg %p2856_p8 }
 0x394   : > { %3107 = dma.done.wait (%p2857_p10), %s2040_s27, 2048  }
 0x395   : > { %3109 = vsyncadd (%p2857_p10), %s2040_s27, 4294965248  ;;  %s22_s8 = sadd.s32 1, %s3140_s8   ;;  %s4348_s27 = sld [smem:[#allocation19_spill]] }
 0x396   : > { %p19_p12 = scmp.ge.s32.totalorder %s22_s8, 6   ;;  %s4349_s28 = sld [smem:[#allocation20_spill]] }
 0x397   : > { %s4350_s29 = sld [smem:[#allocation21_spill]]  ;;  %s4352_s24 = smov %s3116_s25 }
 0x398   : > { %s4351_s30 = sld [smem:[#allocation22_spill]]  ;;  %s4353_s25 = smov %s3120_s26 }
 0x399   : > { %s4354_s26 = smov %s3270_s21  ;;  %21 = sbr.rel (!%p19_p12) target bundleno = 11 (0xb), region = 95 }
 0x39e   :  { %2045 = vsyncpa [#allocation5], 1 }
 0x39f   :  { %2047 = vsyncpa [#allocation5 + $0x1], 1 }
 0x3a0   :  { %2048 = vsyncpa [#allocation8], 1 }
 0x3a1   :  { %2049 = vsyncpa [#allocation6], 1 }
 0x3a2   :  { %2051 = vsyncpa [#allocation6 + $0x1], 1 }
 0x3a3   :  { %2052 = vsyncmov [#allocation3] }
 0x3a6   :  { %s2053_s15 = vpop.sfrf %2052 }
 0x3a7   :  { %p2202_p3 = scmp.ne.s32.totalorder %s2053_s15, 0 }
 0x3a9   :  { %2057 = shalt.err (%p2202_p3)  }

</bundles_post_ra>
